<compile_context>
chip_gen: v7x
topology: tpu7x:2x2x1
jax: 0.10.0
libtpu: 0.0.40
codegen_flags: <defaults>
</compile_context>

<pallas_src>
import math

import jax
import jax.numpy as jnp
from jax import lax
from jax.experimental import pallas as pl
from jax.experimental.pallas import tpu as pltpu


# ---------------------------------------------------------------------------
# helpers
# ---------------------------------------------------------------------------
def _pick_tile(n, target, mult=8):
    """Largest divisor of n that is <= target and a multiple of `mult` (or n itself)."""
    if n <= target:
        return n
    t = (target // mult) * mult
    while t >= mult:
        if n % t == 0:
            return t
        t -= mult
    return n


# ---------------------------------------------------------------------------
# Kernel A: fused per-pixel 1x1-conv MLP
#   x[tm, Cin] -> relu(xW1+b1) -> relu(.W2+b2) -> .W3+b3 (=feat, 64ch)
#             -> relu -> .(W4@W{L,R}) + (b4@W{L,R})   (per-side projection, 32ch)
# The final weight differs per side (L uses even interleave rows of volume12's
# first conv, R uses odd rows); sides are a leading grid axis of size 2.
# ---------------------------------------------------------------------------
def _feature_kernel(x_ref, w1_ref, b1_ref, w2_ref, b2_ref, w3_ref, b3_ref,
                    w4_ref, b4_ref, o_ref):
    x = x_ref[...]
    h = jnp.maximum(
        jnp.dot(x, w1_ref[...], preferred_element_type=jnp.float32) + b1_ref[...], 0.0)
    h = jnp.maximum(
        jnp.dot(h, w2_ref[...], preferred_element_type=jnp.float32) + b2_ref[...], 0.0)
    feat = jnp.dot(h, w3_ref[...], preferred_element_type=jnp.float32) + b3_ref[...]
    h = jnp.maximum(feat, 0.0)                      # preconv12 starts with ReLU
    o_ref[...] = (jnp.dot(h, w4_ref[...], preferred_element_type=jnp.float32)
                  + b4_ref[...]).astype(o_ref.dtype)


def _run_features(xs, feat_args, tm=512, out_dtype=jnp.float32):
    """xs: [2, N, Cin] (L/R stacked) -> [2, N, 32] per-side projections."""
    w1, b1, w2, b2, w3, b3, w4s, b4s = feat_args
    S, N, cin = xs.shape
    cout = w4s.shape[-1]
    n_pad = pl.cdiv(N, tm) * tm
    if n_pad != N:                                   # zero-pad the row tail
        xs = jnp.pad(xs, ((0, 0), (0, n_pad - N), (0, 0)))

    def shared(p):
        return pl.BlockSpec(p.shape, lambda s, m: (0,) * p.ndim)

    out = pl.pallas_call(
        _feature_kernel,
        out_shape=jax.ShapeDtypeStruct((S, n_pad, cout), out_dtype),
        grid_spec=pltpu.PrefetchScalarGridSpec(
            num_scalar_prefetch=0,
            grid=(S, n_pad // tm),
            in_specs=[pl.BlockSpec((None, tm, cin), lambda s, m: (s, m, 0)),
                      shared(w1), shared(b1), shared(w2), shared(b2),
                      shared(w3), shared(b3),
                      pl.BlockSpec((None,) + w4s.shape[1:], lambda s, m: (s, 0, 0)),
                      pl.BlockSpec((None,) + b4s.shape[1:], lambda s, m: (s, 0, 0))],
            out_specs=pl.BlockSpec((None, tm, cout), lambda s, m: (s, m, 0)),
        ),
        compiler_params=pltpu.CompilerParams(
            dimension_semantics=("parallel", "parallel")),
    )(xs, w1, b1, w2, b2, w3, b3, w4s, b4s)
    return out[:, :N, :]


# ---------------------------------------------------------------------------
# Kernel B: per-disparity fuse + volume12 tail + masked write
#   For grid point (b, h-tile, d):
#     pr_shift = left-padded pR sliced at offset (Dpad - d)   (zero-copy shift)
#     h1 = relu(pL + pr_shift + bv1)            [th, W, 32]
#     h2 = relu(h1 @ Wv2 + bv2)                 [th*W, 16]    (one big MXU matmul)
#     out = relu(sum(h2 * wv3, -1) + bv3)       [th, W]
#   columns w < d are masked to 0; output written directly at [b, d, h-tile, :].
# ---------------------------------------------------------------------------
def _volume_kernel(l_ref, r_ref, b1_ref, w2_ref, b2_ref, w3_ref, b3_ref, o_ref):
    d = pl.program_id(2)
    tH, W, O1 = l_ref.shape
    Wp = r_ref.shape[1]
    dpad = Wp - W
    O2 = w2_ref.shape[1]

    # Zero-copy disparity shift: padded columns (< dpad) are zeros, and any
    # column with w < d is masked out of the output below anyway.
    r_shift = r_ref[:, pl.ds(dpad - d, W), :]                    # [tH, W, O1]

    h1 = jnp.maximum(l_ref[...] + r_shift + b1_ref[...], 0.0)    # [tH, W, O1]
    h2 = jnp.maximum(
        jnp.dot(h1.reshape(tH * W, O1), w2_ref[...],
                preferred_element_type=jnp.float32) + b2_ref[...], 0.0)
    out = jnp.sum(h2.reshape(tH, W, O2) * w3_ref[...], axis=-1) + b3_ref[...]
    out = jnp.maximum(out, 0.0)                                  # [tH, W]

    cols = lax.broadcasted_iota(jnp.int32, (tH, W), 1)
    o_ref[...] = jnp.where(cols >= d, out, 0.0).astype(o_ref.dtype)


def _run_volume(pL, pRp, vol_args, volume_size, th_target=64):
    """pL: [B, H, W, 32], pRp: [B, H, W + volume_size, 32] -> [B, D, H, W]."""
    bv1, wv2, bv2, w3v, bv3 = vol_args
    B, H, W, O1 = pL.shape
    Wp = pRp.shape[2]
    th = _pick_tile(H, th_target)

    def shared(p):
        return pl.BlockSpec(p.shape, lambda b, h, d: (0,) * p.ndim)

    return pl.pallas_call(
        _volume_kernel,
        out_shape=jax.ShapeDtypeStruct((B, volume_size, H, W), jnp.float32),
        grid_spec=pltpu.PrefetchScalarGridSpec(
            num_scalar_prefetch=0,
            grid=(B, H // th, volume_size),
            in_specs=[pl.BlockSpec((None, th, W, O1), lambda b, h, d: (b, h, 0, 0)),
                      pl.BlockSpec((None, th, Wp, O1), lambda b, h, d: (b, h, 0, 0)),
                      shared(bv1), shared(wv2), shared(bv2), shared(w3v), shared(bv3)],
            out_specs=pl.BlockSpec((None, None, th, W), lambda b, h, d: (b, d, h, 0)),
        ),
        compiler_params=pltpu.CompilerParams(
            dimension_semantics=("parallel", "parallel", "parallel"),
            vmem_limit_bytes=48 * 1024 * 1024),
    )(pL, pRp, bv1, wv2, bv2, w3v, bv3)


# ---------------------------------------------------------------------------
# Wrapper (NCHW glue, weight composition, padding)
# ---------------------------------------------------------------------------
def volume_construct_forward(features_L, features_R, params, volume_size,
                             tm=512, th_target=64):
    """features_*: NCHW [B, Cin, H, W] -> volume [B, volume_size, H, W]."""
    B, cin, H, W = features_L.shape
    N = B * H * W

    xL = jnp.transpose(features_L, (0, 2, 3, 1)).reshape(N, cin)
    xR = jnp.transpose(features_R, (0, 2, 3, 1)).reshape(N, cin)
    xs = jnp.stack([xL, xR], axis=0).astype(jnp.float32)          # [2, N, Cin]

    # interweave_tensors puts featL2 in even channels and featR2 in odd channels,
    # so volume12's first conv splits into even/odd input rows; fold those halves
    # into preconv12's final conv (both are 1x1, no nonlinearity in between).
    wl = params['wv1'][0::2, :]                                   # [32, 32]
    wr = params['wv1'][1::2, :]
    w4s = jnp.stack([params['w4'] @ wl, params['w4'] @ wr], axis=0)   # [2, 64, 32]
    b4s = jnp.stack([params['b4'] @ wl, params['b4'] @ wr], axis=0)   # [2, 1, 32]
    feat_args = (params['w1'], params['b1'], params['w2'], params['b2'],
                 params['w3'], params['b3'], w4s, b4s)

    # TODO(synk): on v6e/v7x, storing the projections in bfloat16 halves HBM/VMEM
    # traffic; kept float32 here for exact parity with the f32 reference.
    proj = _run_features(xs, feat_args, tm=tm)                    # [2, N, 32]
    pL = proj[0].reshape(B, H, W, 32)
    pR = proj[1].reshape(B, H, W, 32)
    # Left-pad pR along W so the per-disparity shift is a zero-copy pl.ds slice.
    pRp = jnp.pad(pR, ((0, 0), (0, 0), (volume_size, 0), (0, 0)))

    vol_args = (params['bv1'], params['wv2'], params['bv2'],
                params['wv3'].T, params['bv3'])
    return _run_volume(pL, pRp, vol_args, volume_size, th_target=th_target)


def _fold_convbn(key, cin, cout, eps=1e-5):
    """Deterministic conv(1x1, bias=False)+BN(eval) folded into (W[cin,cout], b[1,cout])."""
    k1, k2, k3, k4, k5 = jax.random.split(key, 5)
    wconv = jax.random.normal(k1, (cout, cin), jnp.float32) / math.sqrt(cin)
    gamma = 1.0 + 0.1 * jax.random.normal(k2, (cout,), jnp.float32)
    beta = 0.1 * jax.random.normal(k3, (cout,), jnp.float32)
    mean = 0.1 * jax.random.normal(k4, (cout,), jnp.float32)
    var = 1.0 + 0.5 * jax.random.uniform(k5, (cout,), jnp.float32)
    scale = gamma / jnp.sqrt(var + eps)
    w_eff = (wconv * scale[:, None]).T              # [cin, cout]
    b_eff = (beta - mean * scale).reshape(1, cout)
    return w_eff, b_eff


def make_params(key, inchannels):
    keys = jax.random.split(key, 7)
    w1, b1 = _fold_convbn(keys[0], inchannels, 256)   # preconv11
    w2, b2 = _fold_convbn(keys[1], 256, 128)
    w3, b3 = _fold_convbn(keys[2], 128, 64)
    w4, b4 = _fold_convbn(keys[3], 64, 32)            # preconv12
    wv1, bv1 = _fold_convbn(keys[4], 64, 32)          # volume12 (interleaved 64ch in)
    wv2, bv2 = _fold_convbn(keys[5], 32, 16)
    wv3, bv3 = _fold_convbn(keys[6], 16, 1)
    return dict(w1=w1, b1=b1, w2=w2, b2=b2, w3=w3, b3=b3, w4=w4, b4=b4,
                wv1=wv1, bv1=bv1, wv2=wv2, bv2=bv2, wv3=wv3, bv3=bv3)


# ---------------------------------------------------------------------------
# Pure-JAX reference (mirrors the PyTorch forward) for verification
# ---------------------------------------------------------------------------
def reference_forward(features_L, features_R, p, volume_size):
    def feats(x):
        xc = jnp.transpose(x, (0, 2, 3, 1)).astype(jnp.float32)
        h = jax.nn.relu(xc @ p['w1'] + p['b1'])
        h = jax.nn.relu(h @ p['w2'] + p['b2'])
        f = h @ p['w3'] + p['b3']
        return jax.nn.relu(f) @ p['w4'] + p['b4']                 # featX2 [B,H,W,32]

    fL = feats(features_L)
    fR = feats(features_R)
    wl = p['wv1'][0::2, :]
    wr = p['wv1'][1::2, :]
    B, H, W, _ = fL.shape
    vol = jnp.zeros((B, volume_size, H, W), jnp.float32)
    for i in range(volume_size):
        Lp = fL[:, :, i:, :]
        Rp = fR[:, :, :W - i, :]
        h = jax.nn.relu(Lp @ wl + Rp @ wr + p['bv1'])
        h = jax.nn.relu(h @ p['wv2'] + p['bv2'])
        o = jax.nn.relu(jnp.sum(h * p['wv3'].T, axis=-1) + p['bv3'][0, 0])
        vol = vol.at[:, i, :, i:].set(o)
    return vol


if __name__ == "__main__":
    B, inchannels, H, W = 2, 16, 16, 16
    volume_size = 8

    key = jax.random.PRNGKey(0)
    kL, kR, kp = jax.random.split(key, 3)
    features_L = jax.random.normal(kL, (B, inchannels, H, W), jnp.float32)
    features_R = jax.random.normal(kR, (B, inchannels, H, W), jnp.float32)
    params = make_params(kp, inchannels)

    vol = volume_construct_forward(features_L, features_R, params, volume_size)
    vol = jax.block_until_ready(vol)
    assert vol.shape == (B, volume_size, H, W)

    ref = reference_forward(features_L, features_R, params, volume_size)
    if not jnp.allclose(vol, ref, atol=1e-3, rtol=1e-3):
        max_err = float(jnp.max(jnp.abs(vol - ref)))
        raise AssertionError(f"mismatch vs reference, max abs err = {max_err}")

    print("KERNEL_OK")
</pallas_src>

<mosaic_0001>
module attributes {stable_mosaic.version = 11 : i64} {
  func.func @_feature_kernel(%arg0: i32, %arg1: i32, %arg2: memref<1x512x16xf32, #tpu.memory_space<vmem>>, %arg3: memref<16x256xf32, #tpu.memory_space<vmem>>, %arg4: memref<1x256xf32, #tpu.memory_space<vmem>>, %arg5: memref<256x128xf32, #tpu.memory_space<vmem>>, %arg6: memref<1x128xf32, #tpu.memory_space<vmem>>, %arg7: memref<128x64xf32, #tpu.memory_space<vmem>>, %arg8: memref<1x64xf32, #tpu.memory_space<vmem>>, %arg9: memref<1x64x32xf32, #tpu.memory_space<vmem>>, %arg10: memref<1x1x32xf32, #tpu.memory_space<vmem>>, %arg11: memref<1x512x32xf32, #tpu.memory_space<vmem>>) attributes {dimension_semantics = [#tpu.dimension_semantics<parallel>, #tpu.dimension_semantics<parallel>], iteration_bounds = array<i64: 2, 1>, scalar_prefetch = 0 : i64, scratch_operands = 0 : i64, tpu.core_type = #tpu.core_type<tc>, window_params = [{transform_indices = @transform_0, window_bounds = array<i64: 1, 512, 16>}, {pipeline_mode = #tpu.pipeline_mode<synchronous>, transform_indices = @transform_1, window_bounds = array<i64: 16, 256>}, {pipeline_mode = #tpu.pipeline_mode<synchronous>, transform_indices = @transform_2, window_bounds = array<i64: 1, 256>}, {pipeline_mode = #tpu.pipeline_mode<synchronous>, transform_indices = @transform_3, window_bounds = array<i64: 256, 128>}, {pipeline_mode = #tpu.pipeline_mode<synchronous>, transform_indices = @transform_4, window_bounds = array<i64: 1, 128>}, {pipeline_mode = #tpu.pipeline_mode<synchronous>, transform_indices = @transform_5, window_bounds = array<i64: 128, 64>}, {pipeline_mode = #tpu.pipeline_mode<synchronous>, transform_indices = @transform_6, window_bounds = array<i64: 1, 64>}, {transform_indices = @transform_7, window_bounds = array<i64: 1, 64, 32>}, {transform_indices = @transform_8, window_bounds = array<i64: 1, 1, 32>}, {transform_indices = @transform_9, window_bounds = array<i64: 1, 512, 32>}]} {
    %c0 = arith.constant 0 : index
    %c0_0 = arith.constant 0 : index
    %c0_1 = arith.constant 0 : index
    %0 = vector.load %arg2[%c0, %c0_0, %c0_1] : memref<1x512x16xf32, #tpu.memory_space<vmem>>, vector<1x512x16xf32>
    %1 = vector.shape_cast %0 : vector<1x512x16xf32> to vector<512x16xf32>
    %c0_2 = arith.constant 0 : index
    %c0_3 = arith.constant 0 : index
    %2 = vector.load %arg3[%c0_2, %c0_3] : memref<16x256xf32, #tpu.memory_space<vmem>>, vector<16x256xf32>
    %cst = arith.constant dense<0.000000e+00> : vector<512x256xf32>
    %3 = tpu.matmul %1, %2, %cst {dimension_numbers = #tpu.dot_dimension_numbers<[1], [0], [0], [1], [0, 0, 1, 1], [], []>} : vector<512x16xf32>, vector<16x256xf32>, vector<512x256xf32> -> vector<512x256xf32>
    %c0_4 = arith.constant 0 : index
    %c0_5 = arith.constant 0 : index
    %4 = vector.load %arg4[%c0_4, %c0_5] : memref<1x256xf32, #tpu.memory_space<vmem>>, vector<1x256xf32>
    %5 = vector.broadcast %4 : vector<1x256xf32> to vector<512x256xf32>
    %6 = arith.addf %3, %5 : vector<512x256xf32>
    %cst_6 = arith.constant 0.000000e+00 : f32
    %7 = vector.broadcast %cst_6 : f32 to vector<512x256xf32>
    %8 = arith.maximumf %6, %7 : vector<512x256xf32>
    %c0_7 = arith.constant 0 : index
    %c0_8 = arith.constant 0 : index
    %9 = vector.load %arg5[%c0_7, %c0_8] : memref<256x128xf32, #tpu.memory_space<vmem>>, vector<256x128xf32>
    %cst_9 = arith.constant dense<0.000000e+00> : vector<512x128xf32>
    %10 = tpu.matmul %8, %9, %cst_9 {dimension_numbers = #tpu.dot_dimension_numbers<[1], [0], [0], [1], [0, 0, 1, 1], [], []>} : vector<512x256xf32>, vector<256x128xf32>, vector<512x128xf32> -> vector<512x128xf32>
    %c0_10 = arith.constant 0 : index
    %c0_11 = arith.constant 0 : index
    %11 = vector.load %arg6[%c0_10, %c0_11] : memref<1x128xf32, #tpu.memory_space<vmem>>, vector<1x128xf32>
    %12 = vector.broadcast %11 : vector<1x128xf32> to vector<512x128xf32>
    %13 = arith.addf %10, %12 : vector<512x128xf32>
    %cst_12 = arith.constant 0.000000e+00 : f32
    %14 = vector.broadcast %cst_12 : f32 to vector<512x128xf32>
    %15 = arith.maximumf %13, %14 : vector<512x128xf32>
    %c0_13 = arith.constant 0 : index
    %c0_14 = arith.constant 0 : index
    %16 = vector.load %arg7[%c0_13, %c0_14] : memref<128x64xf32, #tpu.memory_space<vmem>>, vector<128x64xf32>
    %cst_15 = arith.constant dense<0.000000e+00> : vector<512x64xf32>
    %17 = tpu.matmul %15, %16, %cst_15 {dimension_numbers = #tpu.dot_dimension_numbers<[1], [0], [0], [1], [0, 0, 1, 1], [], []>} : vector<512x128xf32>, vector<128x64xf32>, vector<512x64xf32> -> vector<512x64xf32>
    %c0_16 = arith.constant 0 : index
    %c0_17 = arith.constant 0 : index
    %18 = vector.load %arg8[%c0_16, %c0_17] : memref<1x64xf32, #tpu.memory_space<vmem>>, vector<1x64xf32>
    %19 = vector.broadcast %18 : vector<1x64xf32> to vector<512x64xf32>
    %20 = arith.addf %17, %19 : vector<512x64xf32>
    %cst_18 = arith.constant 0.000000e+00 : f32
    %21 = vector.broadcast %cst_18 : f32 to vector<512x64xf32>
    %22 = arith.maximumf %20, %21 : vector<512x64xf32>
    %c0_19 = arith.constant 0 : index
    %c0_20 = arith.constant 0 : index
    %c0_21 = arith.constant 0 : index
    %23 = vector.load %arg9[%c0_19, %c0_20, %c0_21] : memref<1x64x32xf32, #tpu.memory_space<vmem>>, vector<1x64x32xf32>
    %24 = vector.shape_cast %23 : vector<1x64x32xf32> to vector<64x32xf32>
    %cst_22 = arith.constant dense<0.000000e+00> : vector<512x32xf32>
    %25 = tpu.matmul %22, %24, %cst_22 {dimension_numbers = #tpu.dot_dimension_numbers<[1], [0], [0], [1], [0, 0, 1, 1], [], []>} : vector<512x64xf32>, vector<64x32xf32>, vector<512x32xf32> -> vector<512x32xf32>
    %c0_23 = arith.constant 0 : index
    %c0_24 = arith.constant 0 : index
    %c0_25 = arith.constant 0 : index
    %26 = vector.load %arg10[%c0_23, %c0_24, %c0_25] : memref<1x1x32xf32, #tpu.memory_space<vmem>>, vector<1x1x32xf32>
    %27 = vector.shape_cast %26 : vector<1x1x32xf32> to vector<1x32xf32>
    %28 = vector.broadcast %27 : vector<1x32xf32> to vector<512x32xf32>
    %29 = arith.addf %25, %28 : vector<512x32xf32>
    %c0_26 = arith.constant 0 : index
    %c0_27 = arith.constant 0 : index
    %c0_28 = arith.constant 0 : index
    %30 = vector.load %arg11[%c0_26, %c0_27, %c0_28] : memref<1x512x32xf32, #tpu.memory_space<vmem>>, vector<1x512x32xf32>
    %31 = vector.shape_cast %30 : vector<1x512x32xf32> to vector<512x32xf32>
    %32 = vector.shape_cast %29 : vector<512x32xf32> to vector<1x512x32xf32>
    tpu.vector_store %arg11[%c0_26, %c0_27, %c0_28], %32 {strides = array<i32>} : memref<1x512x32xf32, #tpu.memory_space<vmem>>, vector<1x512x32xf32>,
    return
  }
  func.func @transform_0(%arg0: i32, %arg1: i32) -> (i32, i32, i32) {
    %c0_i32 = arith.constant 0 : i32
    %c0_i32_0 = arith.constant 0 : i32
    return %arg0, %arg1, %c0_i32 : i32, i32, i32
  }
  func.func @transform_1(%arg0: i32, %arg1: i32) -> (i32, i32) {
    %c0_i32 = arith.constant 0 : i32
    %c0_i32_0 = arith.constant 0 : i32
    %c0_i32_1 = arith.constant 0 : i32
    return %c0_i32, %c0_i32_0 : i32, i32
  }
  func.func @transform_2(%arg0: i32, %arg1: i32) -> (i32, i32) {
    %c0_i32 = arith.constant 0 : i32
    %c0_i32_0 = arith.constant 0 : i32
    %c0_i32_1 = arith.constant 0 : i32
    return %c0_i32, %c0_i32_0 : i32, i32
  }
  func.func @transform_3(%arg0: i32, %arg1: i32) -> (i32, i32) {
    %c0_i32 = arith.constant 0 : i32
    %c0_i32_0 = arith.constant 0 : i32
    %c0_i32_1 = arith.constant 0 : i32
    return %c0_i32, %c0_i32_0 : i32, i32
  }
  func.func @transform_4(%arg0: i32, %arg1: i32) -> (i32, i32) {
    %c0_i32 = arith.constant 0 : i32
    %c0_i32_0 = arith.constant 0 : i32
    %c0_i32_1 = arith.constant 0 : i32
    return %c0_i32, %c0_i32_0 : i32, i32
  }
  func.func @transform_5(%arg0: i32, %arg1: i32) -> (i32, i32) {
    %c0_i32 = arith.constant 0 : i32
    %c0_i32_0 = arith.constant 0 : i32
    %c0_i32_1 = arith.constant 0 : i32
    return %c0_i32, %c0_i32_0 : i32, i32
  }
  func.func @transform_6(%arg0: i32, %arg1: i32) -> (i32, i32) {
    %c0_i32 = arith.constant 0 : i32
    %c0_i32_0 = arith.constant 0 : i32
    %c0_i32_1 = arith.constant 0 : i32
    return %c0_i32, %c0_i32_0 : i32, i32
  }
  func.func @transform_7(%arg0: i32, %arg1: i32) -> (i32, i32, i32) {
    %c0_i32 = arith.constant 0 : i32
    %c0_i32_0 = arith.constant 0 : i32
    %c0_i32_1 = arith.constant 0 : i32
    return %arg0, %c0_i32, %c0_i32_0 : i32, i32, i32
  }
  func.func @transform_8(%arg0: i32, %arg1: i32) -> (i32, i32, i32) {
    %c0_i32 = arith.constant 0 : i32
    %c0_i32_0 = arith.constant 0 : i32
    %c0_i32_1 = arith.constant 0 : i32
    return %arg0, %c0_i32, %c0_i32_0 : i32, i32, i32
  }
  func.func @transform_9(%arg0: i32, %arg1: i32) -> (i32, i32, i32) {
    %c0_i32 = arith.constant 0 : i32
    %c0_i32_0 = arith.constant 0 : i32
    return %arg0, %arg1, %c0_i32 : i32, i32, i32
  }
}

</mosaic_0001>

<bundles_post_ra>
// kernel: tpu_custom_call.1
= control target key start
LH: loop header
LB: loop body
LE: loop exit
PB: predicated region body
PF: predicated region fallthrough
CT: control target
= control target key end

     0   :  { %s3731_s30 = smov 0   ;;  %s3733_s10 = smov 0   ;;  %s4688_s0 = inlined_call_operand.vmem [shape: f32[2,512,16], index: 0, kind: input, shape index: {}]   ;;  %s4689_s1 = inlined_call_operand.vmem [shape: f32[16,256], index: 1, kind: input, shape index: {}]   ;;  %s4690_s2 = inlined_call_operand.vmem [shape: f32[1,256], index: 2, kind: input, shape index: {}]   ;;  %s4691_s3 = inlined_call_operand.vmem [shape: f32[256,128], index: 3, kind: input, shape index: {}]   ;;  %s4692_s4 = inlined_call_operand.vmem [shape: f32[1,128], index: 4, kind: input, shape index: {}]   ;;  %s4693_s5 = inlined_call_operand.vmem [shape: f32[128,64], index: 5, kind: input, shape index: {}]   ;;  %s4694_s6 = inlined_call_operand.vmem [shape: f32[1,64], index: 6, kind: input, shape index: {}]   ;;  %s4695_s7 = inlined_call_operand.vmem [shape: f32[2,64,32], index: 7, kind: input, shape index: {}]   ;;  %s4696_s8 = inlined_call_operand.vmem [shape: f32[2,1,32], index: 8, kind: input, shape index: {}]   ;;  %s4697_s9 = inlined_call_operand.vmem [shape: f32[2,512,32], index: 9, kind: output, shape index: {}]  }
   0x1   :  { %s3735_s11 = smov 0  }
   0x2 LB: > { %s31_s12 = sadd.s32 1, %s3673_s10  ;;  %p2986_p0 = scmp.ge.s32.totalorder %s3677_s11, 1  ;;  %s3677_s11 = sphi %s3735_s11, %s19_s11   ;;  %s3673_s10 = sphi %s3733_s10, %s4699_s10   ;;  %s3669_s30 = sphi %s3731_s30, %s4698_s30  }
   0x3   : > { %p33_p1 = scmp.ge.s32.totalorder %s31_s12, 2  ;;  %p326_p2 = scmp.lt.s32.totalorder %s3677_s11, 3 }
   0x5   : > { %s4701_s12 = smov (%p33_p1, %s31_s12), 0  ;;  %p327_p3 = pnand %p2986_p0, %p326_p2 }
   0x6   : > { %v471_v0 = vld [vmem:[%s4689_s1 + $0x8] sm:$0xff] (!%p327_p3)  ;;  %v473_v1 = vld [vmem:[%s4689_s1 + $0x18] sm:$0xff] (!%p327_p3)  ;;  %v470_v2 = vld [vmem:[%s4689_s1] sm:$0xff] (!%p327_p3)  ;;  %p379_p4 = scmp.lt.s32.totalorder (!%p327_p3), %s3669_s30, 1  ;;  %v3679_v5 = vmov (!%p327_p3), 0.0   ;;  %vm486_vm0 = vcmask (!%p327_p3), 130048  }
   0x7   : > { %330 = sbr.rel (%p327_p3) target bundleno = 1138 (0x472), region = 56  ;;  %v3521_v3 = vpack.c.bf16 (!%p327_p3), %v473_v1, %v471_v0  ;;  %v472_v4 = vld [vmem:[%s4689_s1 + $0x10] sm:$0xff] (!%p327_p3)  ;;  %743 = vmatprep.mubr.f32.mxu0 (!%p327_p3), %v3679_v5  ;;  %v1256_v14 = vld [vmem:[%s4691_s3] sm:$0xff] (!%p327_p3)  ;;  %v1257_v15 = vld [vmem:[%s4691_s3 + $0x8] sm:$0xff] (!%p327_p3)  ;;  %v3680_v17 = vmov (!%p327_p3), 0.0|0.0   ;;  %vm2231_vm1 = vcmask (!%p327_p3), 523264  }
   0x8   : > { %v3523_v6 = vpack.c.bf16 (!%p327_p3), %v472_v4, %v470_v2  ;;  %3525 = vmatprep.subr.bf16.mxu1 (!%p327_p3), %v3680_v17  ;;  %v3526_v18 = vpack.c.bf16 (!%p327_p3), %v1257_v15, %v1256_v14  ;;  %v1258_v19 = vld [vmem:[%s4691_s3 + $0x10] sm:$0xff] (!%p327_p3)  ;;  %v1259_v20 = vld [vmem:[%s4691_s3 + $0x18] sm:$0xff] (!%p327_p3)  ;;  %v1260_v23 = vld [vmem:[%s4691_s3 + $0x20] sm:$0xff] (!%p327_p3)  ;;  %vm2809_vm2 = vcmask (!%p327_p3), 261120  }
   0x9   : > { %3522 = vmatprep.subr.bf16.mxu0 (!%p327_p3), %v3521_v3  ;;  %v3529_v22 = vpack.c.bf16 (!%p327_p3), %v1259_v20, %v1258_v19  ;;  %v1261_v24 = vld [vmem:[%s4691_s3 + $0x28] sm:$0xff] (!%p327_p3)  ;;  %v1262_v27 = vld [vmem:[%s4691_s3 + $0x30] sm:$0xff] (!%p327_p3)  ;;  %v1263_v28 = vld [vmem:[%s4691_s3 + $0x38] sm:$0xff] (!%p327_p3) }
   0xa   : > { %3524 = vmatpush1.bf16.msra.mxu0 (!%p327_p3), %v3523_v6  ;;  %3527 = vmatpush1.bf16.msra.mxu1 (!%p327_p3), %v3526_v18  ;;  %v3532_v26 = vpack.c.bf16 (!%p327_p3), %v1261_v24, %v1260_v23  ;;  %v3535_v30 = vpack.c.bf16 (!%p327_p3), %v1263_v28, %v1262_v27  ;;  %v1264_v31 = vld [vmem:[%s4691_s3 + $0x40] sm:$0xff] (!%p327_p3)  ;;  %v1265_v32 = vld [vmem:[%s4691_s3 + $0x48] sm:$0xff] (!%p327_p3)  ;;  %v1266_v35 = vld [vmem:[%s4691_s3 + $0x50] sm:$0xff] (!%p327_p3) }
   0xb   : > { %3528 = vmatprep.subr.bf16.mxu1 (!%p327_p3), %v3680_v17  ;;  %v3538_v34 = vpack.c.bf16 (!%p327_p3), %v1265_v32, %v1264_v31  ;;  %v1267_v36 = vld [vmem:[%s4691_s3 + $0x58] sm:$0xff] (!%p327_p3)  ;;  %v1268_v39 = vld [vmem:[%s4691_s3 + $0x60] sm:$0xff] (!%p327_p3)  ;;  %v1269_v40 = vld [vmem:[%s4691_s3 + $0x68] sm:$0xff] (!%p327_p3) }
   0xc   : > { %v3541_v38 = vpack.c.bf16 (!%p327_p3), %v1267_v36, %v1266_v35  ;;  %v3544_v42 = vpack.c.bf16 (!%p327_p3), %v1269_v40, %v1268_v39  ;;  %v1270_v43 = vld [vmem:[%s4691_s3 + $0x70] sm:$0xff] (!%p327_p3)  ;;  %v1271_v44 = vld [vmem:[%s4691_s3 + $0x78] sm:$0xff] (!%p327_p3)  ;;  %v1272_v47 = vld [vmem:[%s4691_s3 + $0x80] sm:$0xff] (!%p327_p3) }
   0xd   : > { %v3547_v46 = vpack.c.bf16 (!%p327_p3), %v1271_v44, %v1270_v43  ;;  %v1273_v48 = vld [vmem:[%s4691_s3 + $0x88] sm:$0xff] (!%p327_p3)  ;;  %v1274_v51 = vld [vmem:[%s4691_s3 + $0x90] sm:$0xff] (!%p327_p3)  ;;  %v1275_v52 = vld [vmem:[%s4691_s3 + $0x98] sm:$0xff] (!%p327_p3) }
   0xe   : > { %s4703_s30 = smov (!%p379_p4, %s3669_s30), 1  ;;  %3530 = vmatpush1.bf16.msra.mxu1 %v3529_v22  ;;  %v3550_v50 = vpack.c.bf16 %v1273_v48, %v1272_v47  ;;  %v3553_v54 = vpack.c.bf16 %v1275_v52, %v1274_v51  ;;  %v1276_v55 = vld [vmem:[%s4691_s3 + $0xa0] sm:$0xff]  ;;  %v1277_v56 = vld [vmem:[%s4691_s3 + $0xa8] sm:$0xff]  ;;  %v1278_v59 = vld [vmem:[%s4691_s3 + $0xb0] sm:$0xff] }
   0xf   : > { %s3126_s21 = sshll.u32 %s4703_s30, 9  ;;  %3531 = vmatprep.subr.bf16.mxu1 %v3680_v17  ;;  %v3556_v58 = vpack.c.bf16 %v1277_v56, %v1276_v55  ;;  %v1279_v60 = vld [vmem:[%s4691_s3 + $0xb8] sm:$0xff]  ;;  %v1280_v63 = vld [vmem:[%s4691_s3 + $0xc0] sm:$0xff]  ;;  %v1281_v0 = vld [vmem:[%s4691_s3 + $0xc8] sm:$0xff]  ;;  %s3127_s14 = sshll.u32 %s4703_s30, 6 }
  0x10   : > { %s3770_s24 = scalar_lea.vmem %s4688_s0, %s3126_s21  ;;  %v3559_v62 = vpack.c.bf16 %v1279_v60, %v1278_v59  ;;  %v3562_v2 = vpack.c.bf16 %v1281_v0, %v1280_v63  ;;  %v1282_v3 = vld [vmem:[%s4691_s3 + $0xd0] sm:$0xff]  ;;  %v1283_v4 = vld [vmem:[%s4691_s3 + $0xd8] sm:$0xff]  ;;  %v1744_v39 = vld [vmem:[%s4693_s5] sm:$0xff]  ;;  %s4242_s17 = scalar_lea.vmem %s4695_s7, %s3127_s14 }
  0x11   : > { %v406_v7 = vld [vmem:[%s3770_s24] sm:$0xff]  ;;  %v407_v8 = vld [vmem:[%s3770_s24 + $0x8] sm:$0xff]  ;;  %v408_v9 = vld [vmem:[%s3770_s24 + $0x10] sm:$0xff]  ;;  %s395_s26 = scalar_lea.vmem %s4696_s8, %s4703_s30  ;;  %s4483_s28 = scalar_lea.vmem %s4697_s9, %s3126_s21 }
  0x12   : > { %2993 = vmatmul.mubr.msk.f32.vlgmr.msra.gmra.mrb[0].mxu0 %vm486_vm0, %v406_v7  ;;  %v409_v10 = vld [vmem:[%s3770_s24 + $0x18] sm:$0xff]  ;;  %v410_v11 = vld [vmem:[%s3770_s24 + $0x20] sm:$0xff]  ;;  %v411_v12 = vld [vmem:[%s3770_s24 + $0x28] sm:$0xff]  ;;  %3533 = vmatpush1.bf16.msra.mxu1 %v3532_v26  ;;  %v3565_v7 = vpack.c.bf16 %v1283_v4, %v1282_v3 }
  0x13   : > { %749 = vmatprep.mubr.f32.mxu0 %v3679_v5  ;;  %v412_v13 = vld [vmem:[%s3770_s24 + $0x30] sm:$0xff]  ;;  %v413_v16 = vld [vmem:[%s3770_s24 + $0x38] sm:$0xff]  ;;  %v414_v21 = vld [vmem:[%s3770_s24 + $0x40] sm:$0xff]  ;;  %3534 = vmatprep.subr.bf16.mxu1 %v3680_v17 }
  0x14   : > { %v415_v25 = vld [vmem:[%s3770_s24 + $0x48] sm:$0xff]  ;;  %v416_v29 = vld [vmem:[%s3770_s24 + $0x50] sm:$0xff]  ;;  %v417_v33 = vld [vmem:[%s3770_s24 + $0x58] sm:$0xff] }
  0x15   : > { %v418_v37 = vld [vmem:[%s3770_s24 + $0x60] sm:$0xff]  ;;  %v419_v41 = vld [vmem:[%s3770_s24 + $0x68] sm:$0xff]  ;;  %v420_v45 = vld [vmem:[%s3770_s24 + $0x70] sm:$0xff] }
  0x16   : > { %2994 = vmatmul.mubr.msk.f32.gmra.mrb[2].mxu0 %vm486_vm0, %v407_v8  ;;  %3536 = vmatpush1.bf16.msra.mxu1 %v3535_v30  ;;  %v421_v49 = vld [vmem:[%s3770_s24 + $0x78] sm:$0xff]  ;;  %v422_v53 = vld [vmem:[%s3770_s24 + $0x80] sm:$0xff]  ;;  %v423_v57 = vld [vmem:[%s3770_s24 + $0x88] sm:$0xff] }
  0x17   : > { %755 = vmatprep.mubr.f32.mxu0 %v3679_v5  ;;  %3537 = vmatprep.subr.bf16.mxu1 %v3680_v17  ;;  %v424_v61 = vld [vmem:[%s3770_s24 + $0x90] sm:$0xff]  ;;  %v425_v1 = vld [vmem:[%s3770_s24 + $0x98] sm:$0xff]  ;;  %v426_v6 = vld [vmem:[%s3770_s24 + $0xa0] sm:$0xff] }
  0x18   : > { %v1284_v8 = vld [vmem:[%s4691_s3 + $0xe0] sm:$0xff]  ;;  %v428_v14 = vld [vmem:[%s3770_s24 + $0xb0] sm:$0xff]  ;;  %v431_v18 = vld [vmem:[%s3770_s24 + $0xc8] sm:$0xff] }
  0x19   : > { %v432_v19 = vld [vmem:[%s3770_s24 + $0xd0] sm:$0xff]  ;;  %v433_v20 = vld [vmem:[%s3770_s24 + $0xd8] sm:$0xff]  ;;  %v435_v22 = vld [vmem:[%s3770_s24 + $0xe8] sm:$0xff] }
  0x1a   : > { %2995 = vmatmul.mubr.msk.f32.gmra.mrb[4].mxu0 %vm486_vm0, %v408_v9  ;;  %3539 = vmatpush1.bf16.msra.mxu1 %v3538_v34  ;;  %v1285_v9 = vld [vmem:[%s4691_s3 + $0xe8] sm:$0xff]  ;;  %v436_v23 = vld [vmem:[%s3770_s24 + $0xf0] sm:$0xff]  ;;  %v437_v24 = vld [vmem:[%s3770_s24 + $0xf8] sm:$0xff] }
  0x1b   : > { %761 = vmatprep.mubr.f32.mxu0 %v3679_v5  ;;  %3540 = vmatprep.subr.bf16.mxu1 %v3680_v17  ;;  %v439_v26 = vld [vmem:[%s3770_s24 + $0x108] sm:$0xff]  ;;  %v440_v27 = vld [vmem:[%s3770_s24 + $0x110] sm:$0xff]  ;;  %v441_v28 = vld [vmem:[%s3770_s24 + $0x118] sm:$0xff] }
  0x1c   : > { %v443_v30 = vld [vmem:[%s3770_s24 + $0x128] sm:$0xff]  ;;  %v444_v31 = vld [vmem:[%s3770_s24 + $0x130] sm:$0xff]  ;;  %v445_v32 = vld [vmem:[%s3770_s24 + $0x138] sm:$0xff] }
  0x1d   : > { %v447_v34 = vld [vmem:[%s3770_s24 + $0x148] sm:$0xff]  ;;  %v448_v35 = vld [vmem:[%s3770_s24 + $0x150] sm:$0xff]  ;;  %v449_v36 = vld [vmem:[%s3770_s24 + $0x158] sm:$0xff] }
  0x1e   : > { %2996 = vmatmul.mubr.msk.f32.gmra.mrb[6].mxu0 %vm486_vm0, %v409_v10  ;;  %3542 = vmatpush1.bf16.msra.mxu1 %v3541_v38  ;;  %v427_v10 = vld [vmem:[%s3770_s24 + $0xa8] sm:$0xff]  ;;  %v453_v43 = vld [vmem:[%s3770_s24 + $0x178] sm:$0xff]  ;;  %v454_v44 = vld [vmem:[%s3770_s24 + $0x180] sm:$0xff] }
  0x1f   : > { %767 = vmatprep.mubr.f32.mxu0 %v3679_v5  ;;  %3543 = vmatprep.subr.bf16.mxu1 %v3680_v17  ;;  %v451_v38 = vld [vmem:[%s3770_s24 + $0x168] sm:$0xff]  ;;  %v456_v47 = vld [vmem:[%s3770_s24 + $0x190] sm:$0xff]  ;;  %v458_v51 = vld [vmem:[%s3770_s24 + $0x1a0] sm:$0xff] }
  0x20   : > { %v1745_v40 = vld [vmem:[%s4693_s5 + $0x8] sm:$0xff]  ;;  %v474_v52 = vld [vmem:[%s4690_s2] sm:$0x3]  ;;  %v1747_v59 = vld [vmem:[%s4693_s5 + $0x18] sm:$0xff] }
  0x21   : > { %v459_v55 = vld [vmem:[%s3770_s24 + $0x1a8] sm:$0xff]  ;;  %v460_v63 = vld [vmem:[%s3770_s24 + $0x1b0] sm:$0xff] }
  0x22   : > { %2997 = vmatmul.mubr.msk.f32.gmra.mrb[8].mxu0 %vm486_vm0, %v410_v11  ;;  %3545 = vmatpush1.bf16.msra.mxu1 %v3544_v42  ;;  %v3568_v11 = vpack.c.bf16 %v1285_v9, %v1284_v8  ;;  %v452_v42 = vld [vmem:[%s3770_s24 + $0x170] sm:$0xff]  ;;  %v461_v8 = vld [vmem:[%s3770_s24 + $0x1b8] sm:$0xff] }
  0x23   : > { %773 = vmatprep.mubr.f32.mxu0 %v3679_v5  ;;  %3546 = vmatprep.subr.bf16.mxu1 %v3680_v17 }
  0x26   : > { %2998 = vmatmul.mubr.msk.f32.gmra.mrb[10].mxu0 %vm486_vm0, %v411_v12  ;;  %3548 = vmatpush1.bf16.msra.mxu1 %v3547_v46  ;;  %v1286_v12 = vld [vmem:[%s4691_s3 + $0xf0] sm:$0xff]  ;;  %v476_v46 = vlaneseq }
  0x27   : > { %779 = vmatprep.mubr.f32.mxu0 %v3679_v5  ;;  %3549 = vmatprep.subr.bf16.mxu1 %v3680_v17 }
  0x28   : > { %v477_v48 = vshrl.u32 %v476_v46, 7 }
  0x2a   : > { %2999 = vmatmul.mubr.msk.f32.gmra.mrb[12].mxu0 %vm486_vm0, %v412_v13  ;;  %3551 = vmatpush1.bf16.msra.mxu1 %v3550_v50  ;;  %v1287_v13 = vld [vmem:[%s4691_s3 + $0xf8] sm:$0xff]  ;;  %v478_v50 = vsub.s32 0, %v477_v48 }
  0x2b   : > { %785 = vmatprep.mubr.f32.mxu0 %v3679_v5  ;;  %3552 = vmatprep.subr.bf16.mxu1 %v3680_v17  ;;  %v3571_v15 = vpack.c.bf16 %v1287_v13, %v1286_v12 }
  0x2e   : > { %3000 = vmatmul.mubr.msk.f32.gmra.mrb[14].mxu0 %vm486_vm0, %v413_v16  ;;  %3554 = vmatpush1.bf16.msra.mxu1 %v3553_v54  ;;  %v429_v16 = vld [vmem:[%s3770_s24 + $0xb8] sm:$0xff]  ;;  %v4051_v54 = vrot.slane %v474_v52, %v478_v50  ;;  %v467_v50 = vld [vmem:[%s3770_s24 + $0x1e8] sm:$0xff] }
  0x2f   : > { %791 = vmatprep.mubr.f32.mxu0 %v3679_v5  ;;  %3555 = vmatprep.subr.bf16.mxu1 %v3680_v17 }
  0x32   : > { %3001 = vmatmul.mubr.msk.f32.gmra.mrb[16].mxu0 %vm486_vm0, %v414_v21  ;;  %3557 = vmatpush1.bf16.msra.mxu1 %v3556_v58  ;;  %v434_v21 = vld [vmem:[%s3770_s24 + $0xe0] sm:$0xff]  ;;  %v1746_v58 = vld [vmem:[%s4693_s5 + $0x10] sm:$0xff] }
  0x33   : > { %797 = vmatprep.mubr.f32.mxu0 %v3679_v5  ;;  %3558 = vmatprep.subr.bf16.mxu1 %v3680_v17 }
  0x36   : > { %3002 = vmatmul.mubr.msk.f32.gmra.mrb[18].mxu0 %vm486_vm0, %v415_v25  ;;  %3560 = vmatpush1.bf16.msra.mxu1 %v3559_v62  ;;  %v438_v25 = vld [vmem:[%s3770_s24 + $0x100] sm:$0xff]  ;;  %v3577_v62 = vpack.c.bf16 %v1747_v59, %v1746_v58 }
  0x37   : > { %803 = vmatprep.mubr.f32.mxu0 %v3679_v5  ;;  %3561 = vmatprep.subr.bf16.mxu1 %v3680_v17 }
  0x3a   : > { %3003 = vmatmul.mubr.msk.f32.gmra.mrb[20].mxu0 %vm486_vm0, %v416_v29  ;;  %3563 = vmatpush1.bf16.msra.mxu1 %v3562_v2  ;;  %v442_v29 = vld [vmem:[%s3770_s24 + $0x120] sm:$0xff] }
  0x3b   : > { %809 = vmatprep.mubr.f32.mxu0 %v3679_v5  ;;  %3564 = vmatprep.subr.bf16.mxu1 %v3680_v17 }
  0x3e   : > { %3004 = vmatmul.mubr.msk.f32.gmra.mrb[22].mxu0 %vm486_vm0, %v417_v33  ;;  %3566 = vmatpush1.bf16.msra.mxu1 %v3565_v7  ;;  %v446_v33 = vld [vmem:[%s3770_s24 + $0x140] sm:$0xff] }
  0x3f   : > { %815 = vmatprep.mubr.f32.mxu0 %v3679_v5  ;;  %3567 = vmatprep.subr.bf16.mxu1 %v3680_v17 }
  0x42   : > { %3005 = vmatmul.mubr.msk.f32.gmra.mrb[24].mxu0 %vm486_vm0, %v418_v37  ;;  %3569 = vmatpush1.bf16.msra.mxu1 %v3568_v11  ;;  %v450_v37 = vld [vmem:[%s3770_s24 + $0x160] sm:$0xff] }
  0x43   : > { %821 = vmatprep.mubr.f32.mxu0 %v3679_v5  ;;  %3570 = vmatprep.subr.bf16.mxu1 %v3680_v17  ;;  %v430_v17 = vld [vmem:[%s3770_s24 + $0xc0] sm:$0xff] }
  0x46   : > { %3006 = vmatmul.mubr.msk.f32.gmra.mrb[26].mxu0 %vm486_vm0, %v419_v41  ;;  %3572 = vmatpush1.bf16.msra.mxu1 %v3571_v15  ;;  %v3573_v41 = vpack.c.bf16 %v1745_v40, %v1744_v39  ;;  %v462_v15 = vld [vmem:[%s3770_s24 + $0x1c0] sm:$0xff] }
  0x47   : > { %827 = vmatprep.mubr.f32.mxu0 %v3679_v5 }
  0x48   : > { %3574 = vmatprep.subr.bf16.mxu0 %v3573_v41 }
  0x49   : > { %3576 = vmatpush3.bf16.msra.mxu0 %v3573_v41 }
  0x4a   : > { %3007 = vmatmul.mubr.msk.f32.gmra.mrb[28].mxu0 %vm486_vm0, %v420_v45  ;;  %v455_v45 = vld [vmem:[%s3770_s24 + $0x188] sm:$0xff]  ;;  %3578 = vmatprep.subr.bf16.mxu0 %v3577_v62 }
  0x4b   : > { %833 = vmatprep.mubr.f32.mxu0 %v3679_v5 }
  0x4d   : > { %3580 = vmatpush3.bf16.msra.mxu0 %v3577_v62  ;;  %v468_v62 = vld [vmem:[%s3770_s24 + $0x1f0] sm:$0xff] }
  0x4e   : > { %3008 = vmatmul.mubr.msk.f32.gmra.mrb[30].mxu0 %vm486_vm0, %v421_v49  ;;  %v457_v49 = vld [vmem:[%s3770_s24 + $0x198] sm:$0xff] }
  0x4f   : > { %839 = vmatprep.mubr.f32.mxu0 %v3679_v5 }
  0x52   : > { %3009 = vmatmul.mubr.msk.f32.gmra.mrb[32].mxu0 %vm486_vm0, %v422_v53  ;;  %v482_v53 = vsub.s32 1, %v477_v48 }
  0x53   : > { %845 = vmatprep.mubr.f32.mxu0 %v3679_v5 }
  0x54   : > { %v4055_v56 = vrot.slane %v474_v52, %v482_v53  ;;  %v1748_v53 = vld [vmem:[%s4693_s5 + $0x20] sm:$0xff] }
  0x56   : > { %3010 = vmatmul.mubr.msk.f32.gmra.mrb[34].mxu0 %vm486_vm0, %v423_v57 }
  0x57   : > { %851 = vmatprep.mubr.f32.mxu0 %v3679_v5 }
  0x5a   : > { %3011 = vmatmul.mubr.msk.f32.gmra.mrb[36].mxu0 %vm486_vm0, %v424_v61 }
  0x5b   : > { %857 = vmatprep.mubr.f32.mxu0 %v3679_v5 }
  0x5e   : > { %3012 = vmatmul.mubr.msk.f32.gmra.mrb[38].mxu0 %vm486_vm0, %v425_v1 }
  0x5f   : > { %863 = vmatprep.mubr.f32.mxu0 %v3679_v5 }
  0x62   : > { %3013 = vmatmul.mubr.msk.f32.gmra.mrb[40].mxu0 %vm486_vm0, %v426_v6 }
  0x63   : > { %869 = vmatprep.mubr.f32.mxu0 %v3679_v5 }
  0x66   : > { %3014 = vmatmul.mubr.msk.f32.gmra.mrb[42].mxu0 %vm486_vm0, %v427_v10 }
  0x67   : > { %875 = vmatprep.mubr.f32.mxu0 %v3679_v5 }
  0x6a   : > { %3015 = vmatmul.mubr.msk.f32.gmra.mrb[44].mxu0 %vm486_vm0, %v428_v14 }
  0x6b   : > { %881 = vmatprep.mubr.f32.mxu0 %v3679_v5 }
  0x6e   : > { %3016 = vmatmul.mubr.msk.f32.gmra.mrb[46].mxu0 %vm486_vm0, %v429_v16 }
  0x6f   : > { %887 = vmatprep.mubr.f32.mxu0 %v3679_v5 }
  0x72   : > { %3017 = vmatmul.mubr.msk.f32.gmra.mrb[48].mxu0 %vm486_vm0, %v430_v17 }
  0x73   : > { %893 = vmatprep.mubr.f32.mxu0 %v3679_v5 }
  0x76   : > { %3018 = vmatmul.mubr.msk.f32.gmra.mrb[50].mxu0 %vm486_vm0, %v431_v18 }
  0x77   : > { %899 = vmatprep.mubr.f32.mxu0 %v3679_v5 }
  0x7a   : > { %3019 = vmatmul.mubr.msk.f32.gmra.mrb[52].mxu0 %vm486_vm0, %v432_v19 }
  0x7b   : > { %905 = vmatprep.mubr.f32.mxu0 %v3679_v5 }
  0x7e   : > { %3020 = vmatmul.mubr.msk.f32.gmra.mrb[54].mxu0 %vm486_vm0, %v433_v20 }
  0x7f   : > { %911 = vmatprep.mubr.f32.mxu0 %v3679_v5 }
  0x82   : > { %3021 = vmatmul.mubr.msk.f32.gmra.mrb[56].mxu0 %vm486_vm0, %v434_v21 }
  0x83   : > { %917 = vmatprep.mubr.f32.mxu0 %v3679_v5 }
  0x86   : > { %3022 = vmatmul.mubr.msk.f32.gmra.mrb[58].mxu0 %vm486_vm0, %v435_v22  ;;  %v463_v22 = vld [vmem:[%s3770_s24 + $0x1c8] sm:$0xff] }
  0x87   : > { %923 = vmatprep.mubr.f32.mxu0 %v3679_v5 }
  0x8a   : > { %3023 = vmatmul.mubr.msk.f32.gmra.mrb[60].mxu0 %vm486_vm0, %v436_v23 }
  0x8b   : > { %929 = vmatprep.mubr.f32.mxu0 %v3679_v5 }
  0x8e   : > { %3024 = vmatmul.mubr.msk.f32.gmra.mrb[62].mxu0 %vm486_vm0, %v437_v24 }
  0x8f   : > { %935 = vmatprep.mubr.f32.mxu0 %v3679_v5 }
  0x92   : > { %3025 = vmatmul.mubr.msk.f32.gmra.mrb[64].mxu0 %vm486_vm0, %v438_v25 }
  0x93   : > { %941 = vmatprep.mubr.f32.mxu0 %v3679_v5 }
  0x96   : > { %3026 = vmatmul.mubr.msk.f32.gmra.mrb[66].mxu0 %vm486_vm0, %v439_v26 }
  0x97   : > { %947 = vmatprep.mubr.f32.mxu0 %v3679_v5 }
  0x9a   : > { %3027 = vmatmul.mubr.msk.f32.gmra.mrb[68].mxu0 %vm486_vm0, %v440_v27 }
  0x9b   : > { %953 = vmatprep.mubr.f32.mxu0 %v3679_v5 }
  0x9e   : > { %3028 = vmatmul.mubr.msk.f32.gmra.mrb[70].mxu0 %vm486_vm0, %v441_v28 }
  0x9f   : > { %959 = vmatprep.mubr.f32.mxu0 %v3679_v5 }
  0xa2   : > { %3029 = vmatmul.mubr.msk.f32.gmra.mrb[72].mxu0 %vm486_vm0, %v442_v29  ;;  %v464_v29 = vld [vmem:[%s3770_s24 + $0x1d0] sm:$0xff] }
  0xa3   : > { %965 = vmatprep.mubr.f32.mxu0 %v3679_v5 }
  0xa6   : > { %3030 = vmatmul.mubr.msk.f32.gmra.mrb[74].mxu0 %vm486_vm0, %v443_v30 }
  0xa7   : > { %971 = vmatprep.mubr.f32.mxu0 %v3679_v5 }
  0xaa   : > { %3031 = vmatmul.mubr.msk.f32.gmra.mrb[76].mxu0 %vm486_vm0, %v444_v31 }
  0xab   : > { %977 = vmatprep.mubr.f32.mxu0 %v3679_v5 }
  0xae   : > { %3032 = vmatmul.mubr.msk.f32.gmra.mrb[78].mxu0 %vm486_vm0, %v445_v32 }
  0xaf   : > { %983 = vmatprep.mubr.f32.mxu0 %v3679_v5 }
  0xb2   : > { %3033 = vmatmul.mubr.msk.f32.gmra.mrb[80].mxu0 %vm486_vm0, %v446_v33 }
  0xb3   : > { %989 = vmatprep.mubr.f32.mxu0 %v3679_v5 }
  0xb6   : > { %3034 = vmatmul.mubr.msk.f32.gmra.mrb[82].mxu0 %vm486_vm0, %v447_v34 }
  0xb7   : > { %995 = vmatprep.mubr.f32.mxu0 %v3679_v5 }
  0xba   : > { %3035 = vmatmul.mubr.msk.f32.gmra.mrb[84].mxu0 %vm486_vm0, %v448_v35 }
  0xbb   : > { %1001 = vmatprep.mubr.f32.mxu0 %v3679_v5 }
  0xbe   : > { %3036 = vmatmul.mubr.msk.f32.gmra.mrb[86].mxu0 %vm486_vm0, %v449_v36  ;;  %v465_v36 = vld [vmem:[%s3770_s24 + $0x1d8] sm:$0xff] }
  0xbf   : > { %1007 = vmatprep.mubr.f32.mxu0 %v3679_v5 }
  0xc2   : > { %3037 = vmatmul.mubr.msk.f32.gmra.mrb[88].mxu0 %vm486_vm0, %v450_v37 }
  0xc3   : > { %1013 = vmatprep.mubr.f32.mxu0 %v3679_v5 }
  0xc6   : > { %3038 = vmatmul.mubr.msk.f32.gmra.mrb[90].mxu0 %vm486_vm0, %v451_v38 }
  0xc7   : > { %1019 = vmatprep.mubr.f32.mxu0 %v3679_v5 }
  0xca   : > { %3039 = vmatmul.mubr.msk.f32.gmra.mrb[92].mxu0 %vm486_vm0, %v452_v42 }
  0xcb   : > { %1025 = vmatprep.mubr.f32.mxu0 %v3679_v5 }
  0xce   : > { %3040 = vmatmul.mubr.msk.f32.gmra.mrb[94].mxu0 %vm486_vm0, %v453_v43  ;;  %v466_v43 = vld [vmem:[%s3770_s24 + $0x1e0] sm:$0xff] }
  0xcf   : > { %1031 = vmatprep.mubr.f32.mxu0 %v3679_v5 }
  0xd2   : > { %3041 = vmatmul.mubr.msk.f32.gmra.mrb[96].mxu0 %vm486_vm0, %v454_v44 }
  0xd3   : > { %1037 = vmatprep.mubr.f32.mxu0 %v3679_v5 }
  0xd6   : > { %3042 = vmatmul.mubr.msk.f32.gmra.mrb[98].mxu0 %vm486_vm0, %v455_v45 }
  0xd7   : > { %1043 = vmatprep.mubr.f32.mxu0 %v3679_v5 }
  0xda   : > { %3043 = vmatmul.mubr.msk.f32.gmra.mrb[100].mxu0 %vm486_vm0, %v456_v47 }
  0xdb   : > { %1049 = vmatprep.mubr.f32.mxu0 %v3679_v5 }
  0xde   : > { %3044 = vmatmul.mubr.msk.f32.gmra.mrb[102].mxu0 %vm486_vm0, %v457_v49 }
  0xdf   : > { %1055 = vmatprep.mubr.f32.mxu0 %v3679_v5 }
  0xe2   : > { %3045 = vmatmul.mubr.msk.f32.gmra.mrb[104].mxu0 %vm486_vm0, %v458_v51 }
  0xe3   : > { %1061 = vmatprep.mubr.f32.mxu0 %v3679_v5 }
  0xe5   : > { %v745_v57 = vpop.f32.mrb[0].mxu0 }
  0xe6   : > { %v746_v60 = vadd.f32 %v745_v57, %v4051_v54  ;;  %v747_v61 = vpop.f32.mrb[1].mxu0  ;;  %3046 = vmatmul.mubr.msk.f32.gmra.mrb[106].mxu0 %vm486_vm0, %v459_v55  ;;  %v1749_v55 = vld [vmem:[%s4693_s5 + $0x28] sm:$0xff] }
  0xe7   : > { %1067 = vmatprep.mubr.f32.mxu0 %v3679_v5  ;;  %v748_v0 = vadd.f32 %v747_v61, %v4055_v56 }
  0xe8   : > { %v1128_v3 = vmax.f32 %v746_v60, 0.0  ;;  %v3581_v60 = vpack.c.bf16 %v1749_v55, %v1748_v53 }
  0xe9   : > { %v751_v1 = vpop.f32.mrb[2].mxu0  ;;  %v1129_v2 = vmax.f32 %v748_v0, 0.0 }
  0xea   : > { %v752_v4 = vadd.f32 %v751_v1, %v4051_v54  ;;  %v753_v6 = vpop.f32.mrb[3].mxu0  ;;  %3047 = vmatmul.mubr.msk.f32.gmra.mrb[108].mxu0 %vm486_vm0, %v460_v63  ;;  %3582 = vmatprep.subr.bf16.mxu0 %v3581_v60 }
  0xeb   : > { %v754_v7 = vadd.f32 %v753_v6, %v4055_v56  ;;  %1359 = vmatprep.mubr.f32.mxu1 %v1129_v2  ;;  %1073 = vmatprep.mubr.f32.mxu0 %v3679_v5  ;;  %v469_v6 = vld [vmem:[%s3770_s24 + $0x1f8] sm:$0xff] }
  0xec   : > { %1360 = vmatmul.mubr.f32.vlgmr.msra.gmra.mrb[0].mxu1 %v1128_v3  ;;  %v1130_v11 = vmax.f32 %v752_v4, 0.0  ;;  %3584 = vmatpush3.bf16.msra.mxu0 %v3581_v60 }
  0xed   : > { %v1131_v9 = vmax.f32 %v754_v7, 0.0  ;;  %v757_v10 = vpop.f32.mrb[4].mxu0 }
  0xee   : > { %v758_v12 = vadd.f32 %v757_v10, %v4051_v54  ;;  %v759_v13 = vpop.f32.mrb[5].mxu0  ;;  %3048 = vmatmul.mubr.msk.f32.gmra.mrb[110].mxu0 %vm486_vm0, %v461_v8 }
  0xef   : > { %v760_v14 = vadd.f32 %v759_v13, %v4055_v56  ;;  %1364 = vmatprep.mubr.f32.mxu1 %v1131_v9  ;;  %1079 = vmatprep.mubr.f32.mxu0 %v3679_v5 }
  0xf0   : > { %1365 = vmatmul.mubr.f32.gmra.mrb[2].mxu1 %v1130_v11  ;;  %v1132_v18 = vmax.f32 %v758_v12, 0.0 }
  0xf1   : > { %v1133_v16 = vmax.f32 %v760_v14, 0.0  ;;  %v763_v17 = vpop.f32.mrb[6].mxu0 }
  0xf2   : > { %v764_v19 = vadd.f32 %v763_v17, %v4051_v54  ;;  %v765_v20 = vpop.f32.mrb[7].mxu0  ;;  %3049 = vmatmul.mubr.msk.f32.gmra.mrb[112].mxu0 %vm486_vm0, %v462_v15 }
  0xf3   : > { %v766_v21 = vadd.f32 %v765_v20, %v4055_v56  ;;  %1369 = vmatprep.mubr.f32.mxu1 %v1133_v16  ;;  %1085 = vmatprep.mubr.f32.mxu0 %v3679_v5 }
  0xf4   : > { %1370 = vmatmul.mubr.f32.gmra.mrb[4].mxu1 %v1132_v18  ;;  %v1134_v25 = vmax.f32 %v764_v19, 0.0 }
  0xf5   : > { %v1135_v23 = vmax.f32 %v766_v21, 0.0  ;;  %v769_v24 = vpop.f32.mrb[8].mxu0 }
  0xf6   : > { %v770_v26 = vadd.f32 %v769_v24, %v4051_v54  ;;  %v771_v27 = vpop.f32.mrb[9].mxu0  ;;  %3050 = vmatmul.mubr.msk.f32.gmra.mrb[114].mxu0 %vm486_vm0, %v463_v22 }
  0xf7   : > { %v772_v28 = vadd.f32 %v771_v27, %v4055_v56  ;;  %1374 = vmatprep.mubr.f32.mxu1 %v1135_v23  ;;  %1091 = vmatprep.mubr.f32.mxu0 %v3679_v5 }
  0xf8   : > { %1375 = vmatmul.mubr.f32.gmra.mrb[6].mxu1 %v1134_v25  ;;  %v1136_v32 = vmax.f32 %v770_v26, 0.0 }
  0xf9   : > { %v1137_v30 = vmax.f32 %v772_v28, 0.0  ;;  %v775_v31 = vpop.f32.mrb[10].mxu0 }
  0xfa   : > { %v776_v33 = vadd.f32 %v775_v31, %v4051_v54  ;;  %v777_v34 = vpop.f32.mrb[11].mxu0  ;;  %3051 = vmatmul.mubr.msk.f32.gmra.mrb[116].mxu0 %vm486_vm0, %v464_v29 }
  0xfb   : > { %v778_v35 = vadd.f32 %v777_v34, %v4055_v56  ;;  %1379 = vmatprep.mubr.f32.mxu1 %v1137_v30  ;;  %1097 = vmatprep.mubr.f32.mxu0 %v3679_v5 }
  0xfc   : > { %1380 = vmatmul.mubr.f32.gmra.mrb[8].mxu1 %v1136_v32  ;;  %v1138_v39 = vmax.f32 %v776_v33, 0.0 }
  0xfd   : > { %v1139_v37 = vmax.f32 %v778_v35, 0.0  ;;  %v781_v38 = vpop.f32.mrb[12].mxu0 }
  0xfe   : > { %v782_v40 = vadd.f32 %v781_v38, %v4051_v54  ;;  %v783_v41 = vpop.f32.mrb[13].mxu0  ;;  %3052 = vmatmul.mubr.msk.f32.gmra.mrb[118].mxu0 %vm486_vm0, %v465_v36 }
  0xff   : > { %v784_v42 = vadd.f32 %v783_v41, %v4055_v56  ;;  %1384 = vmatprep.mubr.f32.mxu1 %v1139_v37  ;;  %1103 = vmatprep.mubr.f32.mxu0 %v3679_v5 }
 0x100   : > { %1385 = vmatmul.mubr.f32.gmra.mrb[10].mxu1 %v1138_v39  ;;  %v1140_v46 = vmax.f32 %v782_v40, 0.0 }
 0x101   : > { %v1141_v44 = vmax.f32 %v784_v42, 0.0  ;;  %v787_v45 = vpop.f32.mrb[14].mxu0 }
 0x102   : > { %v788_v47 = vadd.f32 %v787_v45, %v4051_v54  ;;  %v789_v48 = vpop.f32.mrb[15].mxu0  ;;  %3053 = vmatmul.mubr.msk.f32.gmra.mrb[120].mxu0 %vm486_vm0, %v466_v43  ;;  %v1751_v45 = vld [vmem:[%s4693_s5 + $0x38] sm:$0xff] }
 0x103   : > { %v790_v49 = vadd.f32 %v789_v48, %v4055_v56  ;;  %1389 = vmatprep.mubr.f32.mxu1 %v1141_v44  ;;  %1109 = vmatprep.mubr.f32.mxu0 %v3679_v5  ;;  %v1750_v44 = vld [vmem:[%s4693_s5 + $0x30] sm:$0xff] }
 0x104   : > { %1390 = vmatmul.mubr.f32.gmra.mrb[12].mxu1 %v1140_v46  ;;  %v1142_v57 = vmax.f32 %v788_v47, 0.0 }
 0x105   : > { %v1143_v51 = vmax.f32 %v790_v49, 0.0  ;;  %v793_v52 = vpop.f32.mrb[16].mxu0  ;;  %v3585_v49 = vpack.c.bf16 %v1751_v45, %v1750_v44 }
 0x106   : > { %v794_v58 = vadd.f32 %v793_v52, %v4051_v54  ;;  %v795_v59 = vpop.f32.mrb[17].mxu0  ;;  %3054 = vmatmul.mubr.msk.f32.gmra.mrb[122].mxu0 %vm486_vm0, %v467_v50 }
 0x107   : > { %v796_v61 = vadd.f32 %v795_v59, %v4055_v56  ;;  %1394 = vmatprep.mubr.f32.mxu1 %v1143_v51  ;;  %1115 = vmatprep.mubr.f32.mxu0 %v3679_v5 }
 0x108   : > { %1395 = vmatmul.mubr.f32.gmra.mrb[14].mxu1 %v1142_v57  ;;  %v1144_v1 = vmax.f32 %v794_v58, 0.0  ;;  %3586 = vmatprep.subr.bf16.mxu0 %v3585_v49 }
 0x109   : > { %v1145_v63 = vmax.f32 %v796_v61, 0.0  ;;  %v799_v0 = vpop.f32.mrb[18].mxu0  ;;  %3588 = vmatpush3.bf16.msra.mxu0 %v3585_v49 }
 0x10a   : > { %v800_v2 = vadd.f32 %v799_v0, %v4051_v54  ;;  %v801_v3 = vpop.f32.mrb[19].mxu0  ;;  %3055 = vmatmul.mubr.msk.f32.gmra.mrb[124].mxu0 %vm486_vm0, %v468_v62 }
 0x10b   : > { %v802_v4 = vadd.f32 %v801_v3, %v4055_v56  ;;  %1399 = vmatprep.mubr.f32.mxu1 %v1145_v63  ;;  %1121 = vmatprep.mubr.f32.mxu0 %v3679_v5 }
 0x10c   : > { %1400 = vmatmul.mubr.f32.gmra.mrb[16].mxu1 %v1144_v1  ;;  %v1146_v9 = vmax.f32 %v800_v2, 0.0 }
 0x10d   : > { %v1147_v7 = vmax.f32 %v802_v4, 0.0  ;;  %v805_v8 = vpop.f32.mrb[20].mxu0 }
 0x10e   : > { %v806_v10 = vadd.f32 %v805_v8, %v4051_v54  ;;  %v807_v11 = vpop.f32.mrb[21].mxu0  ;;  %3056 = vmatmul.mubr.msk.f32.gmra.mrb[126].mxu0 %vm486_vm0, %v469_v6 }
 0x10f   : > { %v808_v12 = vadd.f32 %v807_v11, %v4055_v56  ;;  %1404 = vmatprep.mubr.f32.mxu1 %v1147_v7  ;;  %v1753_v11 = vld [vmem:[%s4693_s5 + $0x48] sm:$0xff] }
 0x110   : > { %1405 = vmatmul.mubr.f32.gmra.mrb[18].mxu1 %v1146_v9  ;;  %v1148_v15 = vmax.f32 %v806_v10, 0.0  ;;  %v1752_v10 = vld [vmem:[%s4693_s5 + $0x40] sm:$0xff] }
 0x111   : > { %v1149_v13 = vmax.f32 %v808_v12, 0.0  ;;  %v811_v14 = vpop.f32.mrb[22].mxu0 }
 0x112   : > { %v812_v16 = vadd.f32 %v811_v14, %v4051_v54  ;;  %v813_v5 = vpop.f32.mrb[23].mxu0 }
 0x113   : > { %v814_v17 = vadd.f32 %v813_v5, %v4055_v56  ;;  %1409 = vmatprep.mubr.f32.mxu1 %v1149_v13 }
 0x114   : > { %1410 = vmatmul.mubr.f32.gmra.mrb[20].mxu1 %v1148_v15  ;;  %v1150_v20 = vmax.f32 %v812_v16, 0.0  ;;  %v3589_v15 = vpack.c.bf16 %v1753_v11, %v1752_v10 }
 0x115   : > { %v1151_v18 = vmax.f32 %v814_v17, 0.0  ;;  %v817_v19 = vpop.f32.mrb[24].mxu0 }
 0x116   : > { %v818_v21 = vadd.f32 %v817_v19, %v4051_v54  ;;  %v819_v22 = vpop.f32.mrb[25].mxu0  ;;  %3590 = vmatprep.subr.bf16.mxu0 %v3589_v15  ;;  %v1755_v19 = vld [vmem:[%s4693_s5 + $0x58] sm:$0xff] }
 0x117   : > { %v820_v23 = vadd.f32 %v819_v22, %v4055_v56  ;;  %1414 = vmatprep.mubr.f32.mxu1 %v1151_v18  ;;  %3592 = vmatpush3.bf16.msra.mxu0 %v3589_v15  ;;  %v1754_v18 = vld [vmem:[%s4693_s5 + $0x50] sm:$0xff] }
 0x118   : > { %1415 = vmatmul.mubr.f32.gmra.mrb[22].mxu1 %v1150_v20  ;;  %v1152_v26 = vmax.f32 %v818_v21, 0.0 }
 0x119   : > { %v1153_v24 = vmax.f32 %v820_v23, 0.0  ;;  %v823_v25 = vpop.f32.mrb[26].mxu0  ;;  %v3593_v23 = vpack.c.bf16 %v1755_v19, %v1754_v18 }
 0x11a   : > { %v824_v27 = vadd.f32 %v823_v25, %v4051_v54  ;;  %v825_v28 = vpop.f32.mrb[27].mxu0 }
 0x11b   : > { %v826_v29 = vadd.f32 %v825_v28, %v4055_v56  ;;  %1419 = vmatprep.mubr.f32.mxu1 %v1153_v24  ;;  %3594 = vmatprep.subr.bf16.mxu0 %v3593_v23  ;;  %v1757_v28 = vld [vmem:[%s4693_s5 + $0x68] sm:$0xff] }
 0x11c   : > { %1420 = vmatmul.mubr.f32.gmra.mrb[24].mxu1 %v1152_v26  ;;  %v1154_v32 = vmax.f32 %v824_v27, 0.0  ;;  %3596 = vmatpush3.bf16.msra.mxu0 %v3593_v23  ;;  %v1756_v27 = vld [vmem:[%s4693_s5 + $0x60] sm:$0xff] }
 0x11d   : > { %v1155_v30 = vmax.f32 %v826_v29, 0.0  ;;  %v829_v31 = vpop.f32.mrb[28].mxu0 }
 0x11e   : > { %v830_v33 = vadd.f32 %v829_v31, %v4051_v54  ;;  %v831_v34 = vpop.f32.mrb[29].mxu0 }
 0x11f   : > { %v832_v35 = vadd.f32 %v831_v34, %v4055_v56  ;;  %1424 = vmatprep.mubr.f32.mxu1 %v1155_v30 }
 0x120   : > { %1425 = vmatmul.mubr.f32.gmra.mrb[26].mxu1 %v1154_v32  ;;  %v1156_v38 = vmax.f32 %v830_v33, 0.0  ;;  %v3597_v32 = vpack.c.bf16 %v1757_v28, %v1756_v27 }
 0x121   : > { %v1157_v36 = vmax.f32 %v832_v35, 0.0  ;;  %v835_v37 = vpop.f32.mrb[30].mxu0 }
 0x122   : > { %v836_v39 = vadd.f32 %v835_v37, %v4051_v54  ;;  %v837_v40 = vpop.f32.mrb[31].mxu0  ;;  %3598 = vmatprep.subr.bf16.mxu0 %v3597_v32  ;;  %v1759_v37 = vld [vmem:[%s4693_s5 + $0x78] sm:$0xff] }
 0x123   : > { %v838_v41 = vadd.f32 %v837_v40, %v4055_v56  ;;  %1429 = vmatprep.mubr.f32.mxu1 %v1157_v36  ;;  %3600 = vmatpush3.bf16.msra.mxu0 %v3597_v32  ;;  %v1758_v36 = vld [vmem:[%s4693_s5 + $0x70] sm:$0xff] }
 0x124   : > { %1430 = vmatmul.mubr.f32.gmra.mrb[28].mxu1 %v1156_v38  ;;  %v1158_v46 = vmax.f32 %v836_v39, 0.0 }
 0x125   : > { %v1159_v42 = vmax.f32 %v838_v41, 0.0  ;;  %v841_v43 = vpop.f32.mrb[32].mxu0  ;;  %v3601_v41 = vpack.c.bf16 %v1759_v37, %v1758_v36 }
 0x126   : > { %v842_v47 = vadd.f32 %v841_v43, %v4051_v54  ;;  %v843_v48 = vpop.f32.mrb[33].mxu0 }
 0x127   : > { %v844_v50 = vadd.f32 %v843_v48, %v4055_v56  ;;  %1434 = vmatprep.mubr.f32.mxu1 %v1159_v42  ;;  %3602 = vmatprep.subr.bf16.mxu0 %v3601_v41 }
 0x128   : > { %1435 = vmatmul.mubr.f32.gmra.mrb[30].mxu1 %v1158_v46  ;;  %v1160_v53 = vmax.f32 %v842_v47, 0.0  ;;  %3604 = vmatpush3.bf16.msra.mxu0 %v3601_v41 }
 0x129   : > { %v1161_v51 = vmax.f32 %v844_v50, 0.0  ;;  %v847_v52 = vpop.f32.mrb[34].mxu0 }
 0x12a   : > { %v848_v55 = vadd.f32 %v847_v52, %v4051_v54  ;;  %v849_v57 = vpop.f32.mrb[35].mxu0 }
 0x12b   : > { %v850_v58 = vadd.f32 %v849_v57, %v4055_v56  ;;  %1439 = vmatprep.mubr.f32.mxu1 %v1161_v51 }
 0x12c   : > { %1440 = vmatmul.mubr.f32.gmra.mrb[32].mxu1 %v1160_v53  ;;  %v1162_v61 = vmax.f32 %v848_v55, 0.0 }
 0x12d   : > { %v1163_v59 = vmax.f32 %v850_v58, 0.0  ;;  %v853_v60 = vpop.f32.mrb[36].mxu0 }
 0x12e   : > { %v854_v62 = vadd.f32 %v853_v60, %v4051_v54  ;;  %v855_v63 = vpop.f32.mrb[37].mxu0 }
 0x12f   : > { %v856_v0 = vadd.f32 %v855_v63, %v4055_v56  ;;  %1444 = vmatprep.mubr.f32.mxu1 %v1163_v59 }
 0x130   : > { %1445 = vmatmul.mubr.f32.gmra.mrb[34].mxu1 %v1162_v61  ;;  %v1164_v3 = vmax.f32 %v854_v62, 0.0 }
 0x131   : > { %v1165_v1 = vmax.f32 %v856_v0, 0.0  ;;  %v859_v2 = vpop.f32.mrb[38].mxu0 }
 0x132   : > { %v860_v4 = vadd.f32 %v859_v2, %v4051_v54  ;;  %v861_v6 = vpop.f32.mrb[39].mxu0 }
 0x133   : > { %v862_v7 = vadd.f32 %v861_v6, %v4055_v56  ;;  %1449 = vmatprep.mubr.f32.mxu1 %v1165_v1 }
 0x134   : > { %1450 = vmatmul.mubr.f32.gmra.mrb[36].mxu1 %v1164_v3  ;;  %v1166_v12 = vmax.f32 %v860_v4, 0.0 }
 0x135   : > { %v1167_v8 = vmax.f32 %v862_v7, 0.0  ;;  %v865_v9 = vpop.f32.mrb[40].mxu0 }
 0x136   : > { %v866_v13 = vadd.f32 %v865_v9, %v4051_v54  ;;  %v867_v14 = vpop.f32.mrb[41].mxu0 }
 0x137   : > { %v868_v16 = vadd.f32 %v867_v14, %v4055_v56  ;;  %1454 = vmatprep.mubr.f32.mxu1 %v1167_v8 }
 0x138   : > { %1455 = vmatmul.mubr.f32.gmra.mrb[38].mxu1 %v1166_v12  ;;  %v1168_v20 = vmax.f32 %v866_v13, 0.0 }
 0x139   : > { %v1169_v5 = vmax.f32 %v868_v16, 0.0  ;;  %v871_v17 = vpop.f32.mrb[42].mxu0 }
 0x13a   : > { %v872_v21 = vadd.f32 %v871_v17, %v4051_v54  ;;  %v873_v22 = vpop.f32.mrb[43].mxu0 }
 0x13b   : > { %v874_v24 = vadd.f32 %v873_v22, %v4055_v56  ;;  %1459 = vmatprep.mubr.f32.mxu1 %v1169_v5 }
 0x13c   : > { %1460 = vmatmul.mubr.f32.gmra.mrb[40].mxu1 %v1168_v20  ;;  %v1170_v29 = vmax.f32 %v872_v21, 0.0 }
 0x13d   : > { %v1171_v25 = vmax.f32 %v874_v24, 0.0  ;;  %v877_v26 = vpop.f32.mrb[44].mxu0 }
 0x13e   : > { %v878_v30 = vadd.f32 %v877_v26, %v4051_v54  ;;  %v879_v31 = vpop.f32.mrb[45].mxu0 }
 0x13f   : > { %v880_v33 = vadd.f32 %v879_v31, %v4055_v56  ;;  %1464 = vmatprep.mubr.f32.mxu1 %v1171_v25 }
 0x140   : > { %1465 = vmatmul.mubr.f32.gmra.mrb[42].mxu1 %v1170_v29  ;;  %v1172_v38 = vmax.f32 %v878_v30, 0.0 }
 0x141   : > { %v1173_v34 = vmax.f32 %v880_v33, 0.0  ;;  %v883_v35 = vpop.f32.mrb[46].mxu0 }
 0x142   : > { %v884_v39 = vadd.f32 %v883_v35, %v4051_v54  ;;  %v885_v40 = vpop.f32.mrb[47].mxu0 }
 0x143   : > { %v886_v42 = vadd.f32 %v885_v40, %v4055_v56  ;;  %1469 = vmatprep.mubr.f32.mxu1 %v1173_v34 }
 0x144   : > { %1470 = vmatmul.mubr.f32.gmra.mrb[44].mxu1 %v1172_v38  ;;  %v1174_v45 = vmax.f32 %v884_v39, 0.0 }
 0x145   : > { %v1175_v43 = vmax.f32 %v886_v42, 0.0  ;;  %v889_v44 = vpop.f32.mrb[48].mxu0 }
 0x146   : > { %v890_v46 = vadd.f32 %v889_v44, %v4051_v54  ;;  %v891_v47 = vpop.f32.mrb[49].mxu0 }
 0x147   : > { %v892_v48 = vadd.f32 %v891_v47, %v4055_v56  ;;  %1474 = vmatprep.mubr.f32.mxu1 %v1175_v43 }
 0x148   : > { %1475 = vmatmul.mubr.f32.gmra.mrb[46].mxu1 %v1174_v45  ;;  %v1176_v51 = vmax.f32 %v890_v46, 0.0 }
 0x149   : > { %v1177_v49 = vmax.f32 %v892_v48, 0.0  ;;  %v895_v50 = vpop.f32.mrb[50].mxu0 }
 0x14a   : > { %v896_v52 = vadd.f32 %v895_v50, %v4051_v54  ;;  %v897_v53 = vpop.f32.mrb[51].mxu0 }
 0x14b   : > { %v898_v55 = vadd.f32 %v897_v53, %v4055_v56  ;;  %1479 = vmatprep.mubr.f32.mxu1 %v1177_v49 }
 0x14c   : > { %1480 = vmatmul.mubr.f32.gmra.mrb[48].mxu1 %v1176_v51  ;;  %v1178_v59 = vmax.f32 %v896_v52, 0.0 }
 0x14d   : > { %v1179_v57 = vmax.f32 %v898_v55, 0.0  ;;  %v901_v58 = vpop.f32.mrb[52].mxu0 }
 0x14e   : > { %v902_v60 = vadd.f32 %v901_v58, %v4051_v54  ;;  %v903_v61 = vpop.f32.mrb[53].mxu0 }
 0x14f   : > { %v904_v62 = vadd.f32 %v903_v61, %v4055_v56  ;;  %1484 = vmatprep.mubr.f32.mxu1 %v1179_v57 }
 0x150   : > { %1485 = vmatmul.mubr.f32.gmra.mrb[50].mxu1 %v1178_v59  ;;  %v1180_v1 = vmax.f32 %v902_v60, 0.0 }
 0x151   : > { %v1181_v63 = vmax.f32 %v904_v62, 0.0  ;;  %v907_v0 = vpop.f32.mrb[54].mxu0 }
 0x152   : > { %v908_v2 = vadd.f32 %v907_v0, %v4051_v54  ;;  %v909_v3 = vpop.f32.mrb[55].mxu0 }
 0x153   : > { %v910_v4 = vadd.f32 %v909_v3, %v4055_v56  ;;  %1489 = vmatprep.mubr.f32.mxu1 %v1181_v63 }
 0x154   : > { %1490 = vmatmul.mubr.f32.gmra.mrb[52].mxu1 %v1180_v1  ;;  %v1182_v8 = vmax.f32 %v908_v2, 0.0 }
 0x155   : > { %v1183_v6 = vmax.f32 %v910_v4, 0.0  ;;  %v913_v7 = vpop.f32.mrb[56].mxu0 }
 0x156   : > { %v914_v9 = vadd.f32 %v913_v7, %v4051_v54  ;;  %v915_v10 = vpop.f32.mrb[57].mxu0 }
 0x157   : > { %v916_v11 = vadd.f32 %v915_v10, %v4055_v56  ;;  %1494 = vmatprep.mubr.f32.mxu1 %v1183_v6 }
 0x158   : > { %1495 = vmatmul.mubr.f32.gmra.mrb[54].mxu1 %v1182_v8  ;;  %v1184_v14 = vmax.f32 %v914_v9, 0.0 }
 0x159   : > { %v1185_v12 = vmax.f32 %v916_v11, 0.0  ;;  %v919_v13 = vpop.f32.mrb[58].mxu0 }
 0x15a   : > { %v920_v15 = vadd.f32 %v919_v13, %v4051_v54  ;;  %v921_v16 = vpop.f32.mrb[59].mxu0 }
 0x15b   : > { %v922_v5 = vadd.f32 %v921_v16, %v4055_v56  ;;  %1499 = vmatprep.mubr.f32.mxu1 %v1185_v12 }
 0x15c   : > { %1500 = vmatmul.mubr.f32.gmra.mrb[56].mxu1 %v1184_v14  ;;  %v1186_v19 = vmax.f32 %v920_v15, 0.0 }
 0x15d   : > { %v1187_v17 = vmax.f32 %v922_v5, 0.0  ;;  %v925_v18 = vpop.f32.mrb[60].mxu0 }
 0x15e   : > { %v926_v20 = vadd.f32 %v925_v18, %v4051_v54  ;;  %v927_v21 = vpop.f32.mrb[61].mxu0 }
 0x15f   : > { %v928_v22 = vadd.f32 %v927_v21, %v4055_v56  ;;  %1504 = vmatprep.mubr.f32.mxu1 %v1187_v17 }
 0x160   : > { %1505 = vmatmul.mubr.f32.gmra.mrb[58].mxu1 %v1186_v19  ;;  %v1188_v25 = vmax.f32 %v926_v20, 0.0 }
 0x161   : > { %v1189_v23 = vmax.f32 %v928_v22, 0.0  ;;  %v931_v24 = vpop.f32.mrb[62].mxu0 }
 0x162   : > { %v932_v26 = vadd.f32 %v931_v24, %v4051_v54  ;;  %v933_v27 = vpop.f32.mrb[63].mxu0 }
 0x163   : > { %v934_v28 = vadd.f32 %v933_v27, %v4055_v56  ;;  %1509 = vmatprep.mubr.f32.mxu1 %v1189_v23 }
 0x164   : > { %1510 = vmatmul.mubr.f32.gmra.mrb[60].mxu1 %v1188_v25  ;;  %v1190_v31 = vmax.f32 %v932_v26, 0.0 }
 0x165   : > { %v1191_v29 = vmax.f32 %v934_v28, 0.0  ;;  %v937_v30 = vpop.f32.mrb[64].mxu0 }
 0x166   : > { %v938_v32 = vadd.f32 %v937_v30, %v4051_v54  ;;  %v939_v33 = vpop.f32.mrb[65].mxu0 }
 0x167   : > { %v940_v34 = vadd.f32 %v939_v33, %v4055_v56  ;;  %1514 = vmatprep.mubr.f32.mxu1 %v1191_v29 }
 0x168   : > { %1515 = vmatmul.mubr.f32.gmra.mrb[62].mxu1 %v1190_v31  ;;  %v1192_v37 = vmax.f32 %v938_v32, 0.0 }
 0x169   : > { %v1193_v35 = vmax.f32 %v940_v34, 0.0  ;;  %v943_v36 = vpop.f32.mrb[66].mxu0 }
 0x16a   : > { %v944_v38 = vadd.f32 %v943_v36, %v4051_v54  ;;  %v945_v39 = vpop.f32.mrb[67].mxu0 }
 0x16b   : > { %v946_v40 = vadd.f32 %v945_v39, %v4055_v56  ;;  %1519 = vmatprep.mubr.f32.mxu1 %v1193_v35 }
 0x16c   : > { %1520 = vmatmul.mubr.f32.gmra.mrb[64].mxu1 %v1192_v37  ;;  %v1194_v43 = vmax.f32 %v944_v38, 0.0 }
 0x16d   : > { %v1195_v41 = vmax.f32 %v946_v40, 0.0  ;;  %v949_v42 = vpop.f32.mrb[68].mxu0 }
 0x16e   : > { %v950_v44 = vadd.f32 %v949_v42, %v4051_v54  ;;  %v951_v45 = vpop.f32.mrb[69].mxu0 }
 0x16f   : > { %v952_v46 = vadd.f32 %v951_v45, %v4055_v56  ;;  %1524 = vmatprep.mubr.f32.mxu1 %v1195_v41 }
 0x170   : > { %1525 = vmatmul.mubr.f32.gmra.mrb[66].mxu1 %v1194_v43  ;;  %v1196_v49 = vmax.f32 %v950_v44, 0.0 }
 0x171   : > { %v1197_v47 = vmax.f32 %v952_v46, 0.0  ;;  %v955_v48 = vpop.f32.mrb[70].mxu0 }
 0x172   : > { %v956_v50 = vadd.f32 %v955_v48, %v4051_v54  ;;  %v957_v51 = vpop.f32.mrb[71].mxu0 }
 0x173   : > { %v958_v52 = vadd.f32 %v957_v51, %v4055_v56  ;;  %1529 = vmatprep.mubr.f32.mxu1 %v1197_v47 }
 0x174   : > { %1530 = vmatmul.mubr.f32.gmra.mrb[68].mxu1 %v1196_v49  ;;  %v1198_v57 = vmax.f32 %v956_v50, 0.0 }
 0x175   : > { %v1199_v53 = vmax.f32 %v958_v52, 0.0  ;;  %v961_v55 = vpop.f32.mrb[72].mxu0 }
 0x176   : > { %v962_v58 = vadd.f32 %v961_v55, %v4051_v54  ;;  %v963_v59 = vpop.f32.mrb[73].mxu0 }
 0x177   : > { %v964_v60 = vadd.f32 %v963_v59, %v4055_v56  ;;  %1534 = vmatprep.mubr.f32.mxu1 %v1199_v53 }
 0x178   : > { %1535 = vmatmul.mubr.f32.gmra.mrb[70].mxu1 %v1198_v57  ;;  %v1200_v63 = vmax.f32 %v962_v58, 0.0 }
 0x179   : > { %v1201_v61 = vmax.f32 %v964_v60, 0.0  ;;  %v967_v62 = vpop.f32.mrb[74].mxu0 }
 0x17a   : > { %v968_v0 = vadd.f32 %v967_v62, %v4051_v54  ;;  %v969_v1 = vpop.f32.mrb[75].mxu0 }
 0x17b   : > { %v970_v2 = vadd.f32 %v969_v1, %v4055_v56  ;;  %1539 = vmatprep.mubr.f32.mxu1 %v1201_v61 }
 0x17c   : > { %1540 = vmatmul.mubr.f32.gmra.mrb[72].mxu1 %v1200_v63  ;;  %v1202_v6 = vmax.f32 %v968_v0, 0.0 }
 0x17d   : > { %v1203_v3 = vmax.f32 %v970_v2, 0.0  ;;  %v973_v4 = vpop.f32.mrb[76].mxu0 }
 0x17e   : > { %v974_v7 = vadd.f32 %v973_v4, %v4051_v54  ;;  %v975_v8 = vpop.f32.mrb[77].mxu0 }
 0x17f   : > { %v976_v9 = vadd.f32 %v975_v8, %v4055_v56  ;;  %1544 = vmatprep.mubr.f32.mxu1 %v1203_v3 }
 0x180   : > { %1545 = vmatmul.mubr.f32.gmra.mrb[74].mxu1 %v1202_v6  ;;  %v1204_v12 = vmax.f32 %v974_v7, 0.0 }
 0x181   : > { %v1205_v10 = vmax.f32 %v976_v9, 0.0  ;;  %v979_v11 = vpop.f32.mrb[78].mxu0 }
 0x182   : > { %v980_v13 = vadd.f32 %v979_v11, %v4051_v54  ;;  %v981_v14 = vpop.f32.mrb[79].mxu0 }
 0x183   : > { %v982_v15 = vadd.f32 %v981_v14, %v4055_v56  ;;  %1549 = vmatprep.mubr.f32.mxu1 %v1205_v10 }
 0x184   : > { %1550 = vmatmul.mubr.f32.gmra.mrb[76].mxu1 %v1204_v12  ;;  %v1206_v17 = vmax.f32 %v980_v13, 0.0 }
 0x185   : > { %v1207_v16 = vmax.f32 %v982_v15, 0.0  ;;  %v985_v5 = vpop.f32.mrb[80].mxu0 }
 0x186   : > { %v986_v18 = vadd.f32 %v985_v5, %v4051_v54  ;;  %v987_v19 = vpop.f32.mrb[81].mxu0 }
 0x187   : > { %v988_v20 = vadd.f32 %v987_v19, %v4055_v56  ;;  %1554 = vmatprep.mubr.f32.mxu1 %v1207_v16 }
 0x188   : > { %1555 = vmatmul.mubr.f32.gmra.mrb[78].mxu1 %v1206_v17  ;;  %v1208_v23 = vmax.f32 %v986_v18, 0.0 }
 0x189   : > { %v1209_v21 = vmax.f32 %v988_v20, 0.0  ;;  %v991_v22 = vpop.f32.mrb[82].mxu0 }
 0x18a   : > { %v992_v24 = vadd.f32 %v991_v22, %v4051_v54  ;;  %v993_v25 = vpop.f32.mrb[83].mxu0 }
 0x18b   : > { %v994_v26 = vadd.f32 %v993_v25, %v4055_v56  ;;  %1559 = vmatprep.mubr.f32.mxu1 %v1209_v21 }
 0x18c   : > { %1560 = vmatmul.mubr.f32.gmra.mrb[80].mxu1 %v1208_v23  ;;  %v1210_v29 = vmax.f32 %v992_v24, 0.0 }
 0x18d   : > { %v1211_v27 = vmax.f32 %v994_v26, 0.0  ;;  %v997_v28 = vpop.f32.mrb[84].mxu0 }
 0x18e   : > { %v998_v30 = vadd.f32 %v997_v28, %v4051_v54  ;;  %v999_v31 = vpop.f32.mrb[85].mxu0 }
 0x18f   : > { %v1000_v32 = vadd.f32 %v999_v31, %v4055_v56  ;;  %1564 = vmatprep.mubr.f32.mxu1 %v1211_v27 }
 0x190   : > { %1565 = vmatmul.mubr.f32.gmra.mrb[82].mxu1 %v1210_v29  ;;  %v1212_v35 = vmax.f32 %v998_v30, 0.0 }
 0x191   : > { %v1213_v33 = vmax.f32 %v1000_v32, 0.0  ;;  %v1003_v34 = vpop.f32.mrb[86].mxu0 }
 0x192   : > { %v1004_v36 = vadd.f32 %v1003_v34, %v4051_v54  ;;  %v1005_v37 = vpop.f32.mrb[87].mxu0 }
 0x193   : > { %v1006_v38 = vadd.f32 %v1005_v37, %v4055_v56  ;;  %1569 = vmatprep.mubr.f32.mxu1 %v1213_v33  ;;  %v2216_v37 = vld [vmem:[%s4242_s17] sm:$0xff] }
 0x194   : > { %1570 = vmatmul.mubr.f32.gmra.mrb[84].mxu1 %v1212_v35  ;;  %v1214_v41 = vmax.f32 %v1004_v36, 0.0 }
 0x195   : > { %v1215_v39 = vmax.f32 %v1006_v38, 0.0  ;;  %v1009_v40 = vpop.f32.mrb[88].mxu0  ;;  %v2217_v38 = vld [vmem:[%s4242_s17 + $0x8] sm:$0xff] }
 0x196   : > { %v1010_v42 = vadd.f32 %v1009_v40, %v4051_v54  ;;  %v1011_v43 = vpop.f32.mrb[89].mxu0 }
 0x197   : > { %v1012_v44 = vadd.f32 %v1011_v43, %v4055_v56  ;;  %1574 = vmatprep.mubr.f32.mxu1 %v1215_v39 }
 0x198   : > { %1575 = vmatmul.mubr.f32.gmra.mrb[86].mxu1 %v1214_v41  ;;  %v1216_v47 = vmax.f32 %v1010_v42, 0.0  ;;  %v4249_v41 = vld [vmem:[%s4692_s4] ss:$0 sm:$0xff]  ;;  %v3605_v42 = vpack.c.bf16 %v2217_v38, %v2216_v37 }
 0x199   : > { %v1217_v45 = vmax.f32 %v1012_v44, 0.0  ;;  %v1015_v46 = vpop.f32.mrb[90].mxu0 }
 0x19a   : > { %v1016_v48 = vadd.f32 %v1015_v46, %v4051_v54  ;;  %v1017_v49 = vpop.f32.mrb[91].mxu0  ;;  %3621 = vmatprep.subr.bf16.mxu1 %v3605_v42  ;;  %3606 = vmatprep.subr.bf16.mxu0 %v3605_v42 }
 0x19b   : > { %v1018_v50 = vadd.f32 %v1017_v49, %v4055_v56  ;;  %1579 = vmatprep.mubr.f32.mxu1 %v1217_v45  ;;  %3625 = vmatpush3.bf16.msra.mxu1 %v3605_v42 }
 0x19c   : > { %1580 = vmatmul.mubr.f32.gmra.mrb[88].mxu1 %v1216_v47  ;;  %v1218_v53 = vmax.f32 %v1016_v48, 0.0 }
 0x19d   : > { %v1219_v51 = vmax.f32 %v1018_v50, 0.0  ;;  %v1021_v52 = vpop.f32.mrb[92].mxu0 }
 0x19e   : > { %v1022_v55 = vadd.f32 %v1021_v52, %v4051_v54  ;;  %v1023_v57 = vpop.f32.mrb[93].mxu0 }
 0x19f   : > { %v1024_v58 = vadd.f32 %v1023_v57, %v4055_v56  ;;  %1584 = vmatprep.mubr.f32.mxu1 %v1219_v51 }
 0x1a0   : > { %1585 = vmatmul.mubr.f32.gmra.mrb[90].mxu1 %v1218_v53  ;;  %v1220_v61 = vmax.f32 %v1022_v55, 0.0 }
 0x1a1   : > { %v1221_v59 = vmax.f32 %v1024_v58, 0.0  ;;  %v1027_v60 = vpop.f32.mrb[94].mxu0 }
 0x1a2   : > { %v1028_v62 = vadd.f32 %v1027_v60, %v4051_v54  ;;  %v1029_v63 = vpop.f32.mrb[95].mxu0 }
 0x1a3   : > { %v1030_v0 = vadd.f32 %v1029_v63, %v4055_v56  ;;  %1589 = vmatprep.mubr.f32.mxu1 %v1221_v59 }
 0x1a4   : > { %1590 = vmatmul.mubr.f32.gmra.mrb[92].mxu1 %v1220_v61  ;;  %v1222_v3 = vmax.f32 %v1028_v62, 0.0 }
 0x1a5   : > { %v1223_v1 = vmax.f32 %v1030_v0, 0.0  ;;  %v1033_v2 = vpop.f32.mrb[96].mxu0 }
 0x1a6   : > { %v1034_v4 = vadd.f32 %v1033_v2, %v4051_v54  ;;  %v1035_v6 = vpop.f32.mrb[97].mxu0 }
 0x1a7   : > { %v1036_v7 = vadd.f32 %v1035_v6, %v4055_v56  ;;  %1594 = vmatprep.mubr.f32.mxu1 %v1223_v1 }
 0x1a8   : > { %1595 = vmatmul.mubr.f32.gmra.mrb[94].mxu1 %v1222_v3  ;;  %v1224_v10 = vmax.f32 %v1034_v4, 0.0 }
 0x1a9   : > { %v1225_v8 = vmax.f32 %v1036_v7, 0.0  ;;  %v1039_v9 = vpop.f32.mrb[98].mxu0 }
 0x1aa   : > { %v1040_v11 = vadd.f32 %v1039_v9, %v4051_v54  ;;  %v1041_v12 = vpop.f32.mrb[99].mxu0 }
 0x1ab   : > { %v1042_v13 = vadd.f32 %v1041_v12, %v4055_v56  ;;  %1599 = vmatprep.mubr.f32.mxu1 %v1225_v8 }
 0x1ac   : > { %1600 = vmatmul.mubr.f32.gmra.mrb[96].mxu1 %v1224_v10  ;;  %v1226_v16 = vmax.f32 %v1040_v11, 0.0 }
 0x1ad   : > { %v1227_v14 = vmax.f32 %v1042_v13, 0.0  ;;  %v1045_v15 = vpop.f32.mrb[100].mxu0 }
 0x1ae   : > { %v1046_v5 = vadd.f32 %v1045_v15, %v4051_v54  ;;  %v1047_v17 = vpop.f32.mrb[101].mxu0 }
 0x1af   : > { %v1048_v18 = vadd.f32 %v1047_v17, %v4055_v56  ;;  %1604 = vmatprep.mubr.f32.mxu1 %v1227_v14 }
 0x1b0   : > { %1605 = vmatmul.mubr.f32.gmra.mrb[98].mxu1 %v1226_v16  ;;  %v1228_v21 = vmax.f32 %v1046_v5, 0.0 }
 0x1b1   : > { %v1229_v19 = vmax.f32 %v1048_v18, 0.0  ;;  %v1051_v20 = vpop.f32.mrb[102].mxu0 }
 0x1b2   : > { %v1052_v22 = vadd.f32 %v1051_v20, %v4051_v54  ;;  %v1053_v23 = vpop.f32.mrb[103].mxu0 }
 0x1b3   : > { %v1054_v24 = vadd.f32 %v1053_v23, %v4055_v56  ;;  %1609 = vmatprep.mubr.f32.mxu1 %v1229_v19 }
 0x1b4   : > { %1610 = vmatmul.mubr.f32.gmra.mrb[100].mxu1 %v1228_v21  ;;  %v1230_v27 = vmax.f32 %v1052_v22, 0.0 }
 0x1b5   : > { %v1231_v25 = vmax.f32 %v1054_v24, 0.0  ;;  %v1057_v26 = vpop.f32.mrb[104].mxu0 }
 0x1b6   : > { %v1058_v28 = vadd.f32 %v1057_v26, %v4051_v54  ;;  %v1059_v29 = vpop.f32.mrb[105].mxu0 }
 0x1b7   : > { %v1060_v30 = vadd.f32 %v1059_v29, %v4055_v56  ;;  %1614 = vmatprep.mubr.f32.mxu1 %v1231_v25 }
 0x1b8   : > { %1615 = vmatmul.mubr.f32.gmra.mrb[102].mxu1 %v1230_v27  ;;  %v1232_v33 = vmax.f32 %v1058_v28, 0.0 }
 0x1b9   : > { %v1233_v31 = vmax.f32 %v1060_v30, 0.0  ;;  %v1063_v32 = vpop.f32.mrb[106].mxu0 }
 0x1ba   : > { %v1064_v34 = vadd.f32 %v1063_v32, %v4051_v54  ;;  %v1065_v35 = vpop.f32.mrb[107].mxu0 }
 0x1bb   : > { %v1066_v36 = vadd.f32 %v1065_v35, %v4055_v56  ;;  %1619 = vmatprep.mubr.f32.mxu1 %v1233_v31 }
 0x1bc   : > { %1620 = vmatmul.mubr.f32.gmra.mrb[104].mxu1 %v1232_v33  ;;  %v1234_v43 = vmax.f32 %v1064_v34, 0.0 }
 0x1bd   : > { %v1235_v39 = vmax.f32 %v1066_v36, 0.0  ;;  %v1069_v40 = vpop.f32.mrb[108].mxu0 }
 0x1be   : > { %v1070_v44 = vadd.f32 %v1069_v40, %v4051_v54  ;;  %v1071_v45 = vpop.f32.mrb[109].mxu0 }
 0x1bf   : > { %v1072_v46 = vadd.f32 %v1071_v45, %v4055_v56  ;;  %v1361_v47 = vpop.f32.mrb[0].mxu1  ;;  %1624 = vmatprep.mubr.f32.mxu1 %v1235_v39 }
 0x1c0   : > { %v1362_v48 = vadd.f32 %v4249_v41, %v1361_v47  ;;  %v1363_v49 = vpop.f32.mrb[1].mxu1  ;;  %1625 = vmatmul.mubr.f32.gmra.mrb[106].mxu1 %v1234_v43  ;;  %v1236_v52 = vmax.f32 %v1070_v44, 0.0 }
 0x1c1   : > { %v1237_v50 = vmax.f32 %v1072_v46, 0.0  ;;  %v1075_v51 = vpop.f32.mrb[110].mxu0 }
 0x1c2   : > { %v1680_v53 = vmax.f32 %v1362_v48, 0.0  ;;  %v1076_v55 = vadd.f32 %v1075_v51, %v4051_v54  ;;  %v1077_v57 = vpop.f32.mrb[111].mxu0 }
 0x1c3   : > { %v1078_v58 = vadd.f32 %v1077_v57, %v4055_v56  ;;  %v1366_v59 = vpop.f32.mrb[2].mxu1  ;;  %1629 = vmatprep.mubr.f32.mxu1 %v1237_v50 }
 0x1c4   : > { %v1367_v60 = vadd.f32 %v4249_v41, %v1366_v59  ;;  %v1368_v61 = vpop.f32.mrb[3].mxu1  ;;  %1630 = vmatmul.mubr.f32.gmra.mrb[108].mxu1 %v1236_v52  ;;  %3313 = vmatprep.mubr.f32.mxu0 %v1680_v53  ;;  %v1238_v0 = vmax.f32 %v1076_v55, 0.0 }
 0x1c5   : > { %v1239_v62 = vmax.f32 %v1078_v58, 0.0  ;;  %v1081_v63 = vpop.f32.mrb[112].mxu0 }
 0x1c6   : > { %v1681_v1 = vmax.f32 %v1367_v60, 0.0  ;;  %v1082_v2 = vadd.f32 %v1081_v63, %v4051_v54  ;;  %v1083_v3 = vpop.f32.mrb[113].mxu0 }
 0x1c7   : > { %v1084_v4 = vadd.f32 %v1083_v3, %v4055_v56  ;;  %v1371_v6 = vpop.f32.mrb[4].mxu1  ;;  %1634 = vmatprep.mubr.f32.mxu1 %v1239_v62 }
 0x1c8   : > { %v1372_v7 = vadd.f32 %v4249_v41, %v1371_v6  ;;  %v1373_v8 = vpop.f32.mrb[5].mxu1  ;;  %1635 = vmatmul.mubr.f32.gmra.mrb[110].mxu1 %v1238_v0  ;;  %3314 = vmatmul.mubr.f32.vlgmr.msra.gmra.mrb[128].mxu0 %v1681_v1  ;;  %v1240_v11 = vmax.f32 %v1082_v2, 0.0 }
 0x1c9   : > { %v1241_v9 = vmax.f32 %v1084_v4, 0.0  ;;  %v1087_v10 = vpop.f32.mrb[114].mxu0  ;;  %3608 = vmatpush3.bf16.msra.mxu0 %v3605_v42 }
 0x1ca   : > { %v1682_v12 = vmax.f32 %v1372_v7, 0.0  ;;  %v1088_v13 = vadd.f32 %v1087_v10, %v4051_v54  ;;  %v1089_v14 = vpop.f32.mrb[115].mxu0 }
 0x1cb   : > { %v1090_v15 = vadd.f32 %v1089_v14, %v4055_v56  ;;  %v1376_v16 = vpop.f32.mrb[6].mxu1  ;;  %1639 = vmatprep.mubr.f32.mxu1 %v1241_v9 }
 0x1cc   : > { %v1377_v5 = vadd.f32 %v4249_v41, %v1376_v16  ;;  %v1378_v17 = vpop.f32.mrb[7].mxu1  ;;  %1640 = vmatmul.mubr.f32.gmra.mrb[112].mxu1 %v1240_v11  ;;  %3316 = vmatprep.mubr.f32.mxu0 %v1682_v12  ;;  %v1242_v20 = vmax.f32 %v1088_v13, 0.0 }
 0x1cd   : > { %v1243_v18 = vmax.f32 %v1090_v15, 0.0  ;;  %v1093_v19 = vpop.f32.mrb[116].mxu0 }
 0x1ce   : > { %v1683_v21 = vmax.f32 %v1377_v5, 0.0  ;;  %v1094_v22 = vadd.f32 %v1093_v19, %v4051_v54  ;;  %v1095_v23 = vpop.f32.mrb[117].mxu0 }
 0x1cf   : > { %v1096_v24 = vadd.f32 %v1095_v23, %v4055_v56  ;;  %v1381_v25 = vpop.f32.mrb[8].mxu1  ;;  %1644 = vmatprep.mubr.f32.mxu1 %v1243_v18 }
 0x1d0   : > { %v1382_v26 = vadd.f32 %v4249_v41, %v1381_v25  ;;  %v1383_v27 = vpop.f32.mrb[9].mxu1  ;;  %1645 = vmatmul.mubr.f32.gmra.mrb[114].mxu1 %v1242_v20  ;;  %3317 = vmatmul.mubr.f32.gmra.mrb[130].mxu0 %v1683_v21  ;;  %v1244_v30 = vmax.f32 %v1094_v22, 0.0 }
 0x1d1   : > { %v1245_v28 = vmax.f32 %v1096_v24, 0.0  ;;  %v1099_v29 = vpop.f32.mrb[118].mxu0 }
 0x1d2   : > { %v1684_v31 = vmax.f32 %v1382_v26, 0.0  ;;  %v1100_v32 = vadd.f32 %v1099_v29, %v4051_v54  ;;  %v1101_v33 = vpop.f32.mrb[119].mxu0 }
 0x1d3   : > { %v1102_v34 = vadd.f32 %v1101_v33, %v4055_v56  ;;  %v1386_v35 = vpop.f32.mrb[10].mxu1  ;;  %1649 = vmatprep.mubr.f32.mxu1 %v1245_v28 }
 0x1d4   : > { %v1387_v36 = vadd.f32 %v4249_v41, %v1386_v35  ;;  %v1388_v37 = vpop.f32.mrb[11].mxu1  ;;  %1650 = vmatmul.mubr.f32.gmra.mrb[116].mxu1 %v1244_v30  ;;  %3319 = vmatprep.mubr.f32.mxu0 %v1684_v31  ;;  %v1246_v40 = vmax.f32 %v1100_v32, 0.0 }
 0x1d5   : > { %v1247_v38 = vmax.f32 %v1102_v34, 0.0  ;;  %v1105_v39 = vpop.f32.mrb[120].mxu0 }
 0x1d6   : > { %v1685_v42 = vmax.f32 %v1387_v36, 0.0  ;;  %v1106_v43 = vadd.f32 %v1105_v39, %v4051_v54  ;;  %v1107_v44 = vpop.f32.mrb[121].mxu0  ;;  %v2219_v39 = vld [vmem:[%s4242_s17 + $0x18] sm:$0xff] }
 0x1d7   : > { %v1108_v45 = vadd.f32 %v1107_v44, %v4055_v56  ;;  %v1391_v46 = vpop.f32.mrb[12].mxu1  ;;  %1654 = vmatprep.mubr.f32.mxu1 %v1247_v38  ;;  %v2218_v38 = vld [vmem:[%s4242_s17 + $0x10] sm:$0xff] }
 0x1d8   : > { %v1392_v47 = vadd.f32 %v4249_v41, %v1391_v46  ;;  %v1393_v48 = vpop.f32.mrb[13].mxu1  ;;  %1655 = vmatmul.mubr.f32.gmra.mrb[118].mxu1 %v1246_v40  ;;  %3320 = vmatmul.mubr.f32.gmra.mrb[132].mxu0 %v1685_v42  ;;  %v1248_v51 = vmax.f32 %v1106_v43, 0.0  ;;  %v3609_v42 = vpack.c.bf16 %v2219_v39, %v2218_v38 }
 0x1d9   : > { %v1249_v49 = vmax.f32 %v1108_v45, 0.0  ;;  %v1111_v50 = vpop.f32.mrb[122].mxu0 }
 0x1da   : > { %v1686_v52 = vmax.f32 %v1392_v47, 0.0  ;;  %v1112_v53 = vadd.f32 %v1111_v50, %v4051_v54  ;;  %v1113_v55 = vpop.f32.mrb[123].mxu0  ;;  %3622 = vmatprep.subr.bf16.mxu1 %v3609_v42  ;;  %3610 = vmatprep.subr.bf16.mxu0 %v3609_v42 }
 0x1db   : > { %v1114_v57 = vadd.f32 %v1113_v55, %v4055_v56  ;;  %v1396_v58 = vpop.f32.mrb[14].mxu1  ;;  %1659 = vmatprep.mubr.f32.mxu1 %v1249_v49  ;;  %3626 = vmatpush3.bf16.msra.mxu1 %v3609_v42 }
 0x1dc   : > { %v1397_v59 = vadd.f32 %v4249_v41, %v1396_v58  ;;  %v1398_v60 = vpop.f32.mrb[15].mxu1  ;;  %1660 = vmatmul.mubr.f32.gmra.mrb[120].mxu1 %v1248_v51  ;;  %3322 = vmatprep.mubr.f32.mxu0 %v1686_v52  ;;  %v1250_v63 = vmax.f32 %v1112_v53, 0.0 }
 0x1dd   : > { %v1251_v61 = vmax.f32 %v1114_v57, 0.0  ;;  %v1117_v62 = vpop.f32.mrb[124].mxu0  ;;  %3612 = vmatpush3.bf16.msra.mxu0 %v3609_v42  ;;  %v2220_v42 = vld [vmem:[%s4242_s17 + $0x20] sm:$0xff] }
 0x1de   : > { %v1687_v0 = vmax.f32 %v1397_v59, 0.0  ;;  %v1118_v1 = vadd.f32 %v1117_v62, %v4051_v54  ;;  %v1119_v2 = vpop.f32.mrb[125].mxu0 }
 0x1df   : > { %v1120_v3 = vadd.f32 %v1119_v2, %v4055_v56  ;;  %v1401_v4 = vpop.f32.mrb[16].mxu1  ;;  %1664 = vmatprep.mubr.f32.mxu1 %v1251_v61 }
 0x1e0   : > { %v1402_v6 = vadd.f32 %v4249_v41, %v1401_v4  ;;  %v1403_v7 = vpop.f32.mrb[17].mxu1  ;;  %1665 = vmatmul.mubr.f32.gmra.mrb[122].mxu1 %v1250_v63  ;;  %3323 = vmatmul.mubr.f32.gmra.mrb[134].mxu0 %v1687_v0  ;;  %v1252_v10 = vmax.f32 %v1118_v1, 0.0 }
 0x1e1   : > { %v1253_v8 = vmax.f32 %v1120_v3, 0.0  ;;  %v1123_v9 = vpop.f32.mrb[126].mxu0 }
 0x1e2   : > { %v1688_v11 = vmax.f32 %v1402_v6, 0.0  ;;  %v1124_v12 = vadd.f32 %v1123_v9, %v4051_v54  ;;  %v1125_v13 = vpop.f32.mrb[127].mxu0 }
 0x1e3   : > { %v1126_v14 = vadd.f32 %v1125_v13, %v4055_v56  ;;  %v1406_v15 = vpop.f32.mrb[18].mxu1  ;;  %1669 = vmatprep.mubr.f32.mxu1 %v1253_v8 }
 0x1e4   : > { %v1407_v16 = vadd.f32 %v4249_v41, %v1406_v15  ;;  %v1408_v5 = vpop.f32.mrb[19].mxu1  ;;  %1670 = vmatmul.mubr.f32.gmra.mrb[124].mxu1 %v1252_v10  ;;  %3325 = vmatprep.mubr.f32.mxu0 %v1688_v11  ;;  %v1254_v18 = vmax.f32 %v1124_v12, 0.0 }
 0x1e5   : > { %v1255_v17 = vmax.f32 %v1126_v14, 0.0 }
 0x1e6   : > { %v1689_v19 = vmax.f32 %v1407_v16, 0.0 }
 0x1e7   : > { %v1411_v20 = vpop.f32.mrb[20].mxu1  ;;  %1674 = vmatprep.mubr.f32.mxu1 %v1255_v17 }
 0x1e8   : > { %v1412_v21 = vadd.f32 %v4249_v41, %v1411_v20  ;;  %v1413_v22 = vpop.f32.mrb[21].mxu1  ;;  %1675 = vmatmul.mubr.f32.gmra.mrb[126].mxu1 %v1254_v18  ;;  %3326 = vmatmul.mubr.f32.gmra.mrb[136].mxu0 %v1689_v19 }
 0x1ea   : > { %v1690_v54 = vmax.f32 %v1412_v21, 0.0 }
 0x1eb   : > { %v1416_v23 = vpop.f32.mrb[22].mxu1 }
 0x1ec   : > { %v1417_v56 = vadd.f32 %v4249_v41, %v1416_v23  ;;  %v1418_v24 = vpop.f32.mrb[23].mxu1  ;;  %3328 = vmatprep.mubr.f32.mxu0 %v1690_v54 }
 0x1ee   : > { %v1691_v25 = vmax.f32 %v1417_v56, 0.0 }
 0x1ef   : > { %v1421_v26 = vpop.f32.mrb[24].mxu1 }
 0x1f0   : > { %v1422_v27 = vadd.f32 %v4249_v41, %v1421_v26  ;;  %v1423_v28 = vpop.f32.mrb[25].mxu1  ;;  %3329 = vmatmul.mubr.f32.gmra.mrb[138].mxu0 %v1691_v25 }
 0x1f2   : > { %v1692_v29 = vmax.f32 %v1422_v27, 0.0 }
 0x1f3   : > { %v1426_v30 = vpop.f32.mrb[26].mxu1 }
 0x1f4   : > { %v1427_v31 = vadd.f32 %v4249_v41, %v1426_v30  ;;  %v1428_v32 = vpop.f32.mrb[27].mxu1  ;;  %3331 = vmatprep.mubr.f32.mxu0 %v1692_v29 }
 0x1f6   : > { %v1693_v33 = vmax.f32 %v1427_v31, 0.0 }
 0x1f7   : > { %v1431_v34 = vpop.f32.mrb[28].mxu1 }
 0x1f8   : > { %v1432_v35 = vadd.f32 %v4249_v41, %v1431_v34  ;;  %v1433_v36 = vpop.f32.mrb[29].mxu1  ;;  %3332 = vmatmul.mubr.f32.gmra.mrb[140].mxu0 %v1693_v33 }
 0x1fa   : > { %v1694_v37 = vmax.f32 %v1432_v35, 0.0 }
 0x1fb   : > { %v1436_v40 = vpop.f32.mrb[30].mxu1 }
 0x1fc   : > { %v1437_v43 = vadd.f32 %v4249_v41, %v1436_v40  ;;  %v1438_v44 = vpop.f32.mrb[31].mxu1  ;;  %3334 = vmatprep.mubr.f32.mxu0 %v1694_v37 }
 0x1fe   : > { %v1695_v45 = vmax.f32 %v1437_v43, 0.0  ;;  %v2221_v43 = vld [vmem:[%s4242_s17 + $0x28] sm:$0xff] }
 0x1ff   : > { %v1441_v46 = vpop.f32.mrb[32].mxu1 }
 0x200   : > { %v1442_v47 = vadd.f32 %v4249_v41, %v1441_v46  ;;  %v1443_v48 = vpop.f32.mrb[33].mxu1  ;;  %3335 = vmatmul.mubr.f32.gmra.mrb[142].mxu0 %v1695_v45  ;;  %v3613_v45 = vpack.c.bf16 %v2221_v43, %v2220_v42 }
 0x202   : > { %v1696_v49 = vmax.f32 %v1442_v47, 0.0  ;;  %3623 = vmatprep.subr.bf16.mxu1 %v3613_v45  ;;  %3614 = vmatprep.subr.bf16.mxu0 %v3613_v45 }
 0x203   : > { %v1446_v50 = vpop.f32.mrb[34].mxu1  ;;  %3627 = vmatpush3.bf16.msra.mxu1 %v3613_v45  ;;  %3616 = vmatpush3.bf16.msra.mxu0 %v3613_v45 }
 0x204   : > { %v1447_v51 = vadd.f32 %v4249_v41, %v1446_v50  ;;  %v1448_v52 = vpop.f32.mrb[35].mxu1  ;;  %3337 = vmatprep.mubr.f32.mxu0 %v1696_v49  ;;  %v2222_v49 = vld [vmem:[%s4242_s17 + $0x30] sm:$0xff]  ;;  %v2223_v50 = vld [vmem:[%s4242_s17 + $0x38] sm:$0xff] }
 0x205   : > { %v3617_v52 = vpack.c.bf16 %v2223_v50, %v2222_v49 }
 0x206   : > { %v1697_v53 = vmax.f32 %v1447_v51, 0.0 }
 0x207   : > { %v1451_v55 = vpop.f32.mrb[36].mxu1  ;;  %3618 = vmatprep.subr.bf16.mxu0 %v3617_v52  ;;  %3624 = vmatprep.subr.bf16.mxu1 %v3617_v52 }
 0x208   : > { %v1452_v57 = vadd.f32 %v4249_v41, %v1451_v55  ;;  %v1453_v58 = vpop.f32.mrb[37].mxu1  ;;  %3338 = vmatmul.mubr.f32.gmra.mrb[144].mxu0 %v1697_v53  ;;  %3628 = vmatpush3.bf16.msra.mxu1 %v3617_v52 }
 0x209   : > { %3620 = vmatpush3.bf16.msra.mxu0 %v3617_v52 }
 0x20a   : > { %v1698_v59 = vmax.f32 %v1452_v57, 0.0 }
 0x20b   : > { %v1456_v60 = vpop.f32.mrb[38].mxu1 }
 0x20c   : > { %v1457_v61 = vadd.f32 %v4249_v41, %v1456_v60  ;;  %v1458_v62 = vpop.f32.mrb[39].mxu1  ;;  %3340 = vmatprep.mubr.f32.mxu0 %v1698_v59 }
 0x20e   : > { %v1699_v63 = vmax.f32 %v1457_v61, 0.0 }
 0x20f   : > { %v1461_v0 = vpop.f32.mrb[40].mxu1 }
 0x210   : > { %v1462_v1 = vadd.f32 %v4249_v41, %v1461_v0  ;;  %v1463_v2 = vpop.f32.mrb[41].mxu1  ;;  %3341 = vmatmul.mubr.f32.gmra.mrb[146].mxu0 %v1699_v63 }
 0x212   : > { %v1700_v3 = vmax.f32 %v1462_v1, 0.0 }
 0x213   : > { %v1466_v4 = vpop.f32.mrb[42].mxu1 }
 0x214   : > { %v1467_v6 = vadd.f32 %v4249_v41, %v1466_v4  ;;  %v1468_v7 = vpop.f32.mrb[43].mxu1  ;;  %3343 = vmatprep.mubr.f32.mxu0 %v1700_v3 }
 0x216   : > { %v1701_v8 = vmax.f32 %v1467_v6, 0.0 }
 0x217   : > { %v1471_v9 = vpop.f32.mrb[44].mxu1 }
 0x218   : > { %v1472_v10 = vadd.f32 %v4249_v41, %v1471_v9  ;;  %v1473_v11 = vpop.f32.mrb[45].mxu1  ;;  %3344 = vmatmul.mubr.f32.gmra.mrb[148].mxu0 %v1701_v8 }
 0x21a   : > { %v1702_v12 = vmax.f32 %v1472_v10, 0.0 }
 0x21b   : > { %v1476_v13 = vpop.f32.mrb[46].mxu1 }
 0x21c   : > { %v1477_v14 = vadd.f32 %v4249_v41, %v1476_v13  ;;  %v1478_v15 = vpop.f32.mrb[47].mxu1  ;;  %3346 = vmatprep.mubr.f32.mxu0 %v1702_v12 }
 0x21e   : > { %v1703_v16 = vmax.f32 %v1477_v14, 0.0 }
 0x21f   : > { %v1481_v5 = vpop.f32.mrb[48].mxu1 }
 0x220   : > { %v1482_v17 = vadd.f32 %v4249_v41, %v1481_v5  ;;  %v1483_v18 = vpop.f32.mrb[49].mxu1  ;;  %3347 = vmatmul.mubr.f32.gmra.mrb[150].mxu0 %v1703_v16 }
 0x222   : > { %v1704_v19 = vmax.f32 %v1482_v17, 0.0 }
 0x223   : > { %v1486_v20 = vpop.f32.mrb[50].mxu1 }
 0x224   : > { %v1487_v21 = vadd.f32 %v4249_v41, %v1486_v20  ;;  %v1488_v22 = vpop.f32.mrb[51].mxu1  ;;  %3349 = vmatprep.mubr.f32.mxu0 %v1704_v19 }
 0x226   : > { %v1705_v54 = vmax.f32 %v1487_v21, 0.0 }
 0x227   : > { %v1491_v23 = vpop.f32.mrb[52].mxu1 }
 0x228   : > { %v1492_v56 = vadd.f32 %v4249_v41, %v1491_v23  ;;  %v1493_v24 = vpop.f32.mrb[53].mxu1  ;;  %3350 = vmatmul.mubr.f32.gmra.mrb[152].mxu0 %v1705_v54 }
 0x22a   : > { %v1706_v25 = vmax.f32 %v1492_v56, 0.0 }
 0x22b   : > { %v1496_v26 = vpop.f32.mrb[54].mxu1 }
 0x22c   : > { %v1497_v27 = vadd.f32 %v4249_v41, %v1496_v26  ;;  %v1498_v28 = vpop.f32.mrb[55].mxu1  ;;  %3352 = vmatprep.mubr.f32.mxu0 %v1706_v25 }
 0x22e   : > { %v1707_v29 = vmax.f32 %v1497_v27, 0.0 }
 0x22f   : > { %v1501_v30 = vpop.f32.mrb[56].mxu1 }
 0x230   : > { %v1502_v31 = vadd.f32 %v4249_v41, %v1501_v30  ;;  %v1503_v32 = vpop.f32.mrb[57].mxu1  ;;  %3353 = vmatmul.mubr.f32.gmra.mrb[154].mxu0 %v1707_v29 }
 0x232   : > { %v1708_v33 = vmax.f32 %v1502_v31, 0.0 }
 0x233   : > { %v1506_v34 = vpop.f32.mrb[58].mxu1 }
 0x234   : > { %v1507_v35 = vadd.f32 %v4249_v41, %v1506_v34  ;;  %v1508_v36 = vpop.f32.mrb[59].mxu1  ;;  %3355 = vmatprep.mubr.f32.mxu0 %v1708_v33 }
 0x236   : > { %v1709_v37 = vmax.f32 %v1507_v35, 0.0 }
 0x237   : > { %v1511_v38 = vpop.f32.mrb[60].mxu1 }
 0x238   : > { %v1512_v39 = vadd.f32 %v4249_v41, %v1511_v38  ;;  %v1513_v40 = vpop.f32.mrb[61].mxu1  ;;  %3356 = vmatmul.mubr.f32.gmra.mrb[156].mxu0 %v1709_v37 }
 0x23a   : > { %v1710_v44 = vmax.f32 %v1512_v39, 0.0 }
 0x23b   : > { %v1516_v46 = vpop.f32.mrb[62].mxu1 }
 0x23c   : > { %v1517_v47 = vadd.f32 %v4249_v41, %v1516_v46  ;;  %v1518_v48 = vpop.f32.mrb[63].mxu1  ;;  %3358 = vmatprep.mubr.f32.mxu0 %v1710_v44 }
 0x23e   : > { %v1711_v51 = vmax.f32 %v1517_v47, 0.0 }
 0x23f   : > { %v1521_v53 = vpop.f32.mrb[64].mxu1 }
 0x240   : > { %v1522_v55 = vadd.f32 %v4249_v41, %v1521_v53  ;;  %v1523_v57 = vpop.f32.mrb[65].mxu1  ;;  %3359 = vmatmul.mubr.f32.gmra.mrb[158].mxu0 %v1711_v51 }
 0x242   : > { %v1712_v58 = vmax.f32 %v1522_v55, 0.0 }
 0x243   : > { %v1526_v59 = vpop.f32.mrb[66].mxu1 }
 0x244   : > { %v1527_v60 = vadd.f32 %v4249_v41, %v1526_v59  ;;  %v1528_v61 = vpop.f32.mrb[67].mxu1  ;;  %3361 = vmatprep.mubr.f32.mxu0 %v1712_v58 }
 0x246   : > { %v1713_v62 = vmax.f32 %v1527_v60, 0.0 }
 0x247   : > { %v1531_v63 = vpop.f32.mrb[68].mxu1 }
 0x248   : > { %v1532_v0 = vadd.f32 %v4249_v41, %v1531_v63  ;;  %v1533_v1 = vpop.f32.mrb[69].mxu1  ;;  %3362 = vmatmul.mubr.f32.gmra.mrb[160].mxu0 %v1713_v62 }
 0x24a   : > { %v1714_v2 = vmax.f32 %v1532_v0, 0.0 }
 0x24b   : > { %v1536_v3 = vpop.f32.mrb[70].mxu1 }
 0x24c   : > { %v1537_v4 = vadd.f32 %v4249_v41, %v1536_v3  ;;  %v1538_v6 = vpop.f32.mrb[71].mxu1  ;;  %3364 = vmatprep.mubr.f32.mxu0 %v1714_v2 }
 0x24e   : > { %v1715_v7 = vmax.f32 %v1537_v4, 0.0 }
 0x24f   : > { %v1541_v8 = vpop.f32.mrb[72].mxu1 }
 0x250   : > { %v1542_v9 = vadd.f32 %v4249_v41, %v1541_v8  ;;  %v1543_v10 = vpop.f32.mrb[73].mxu1  ;;  %3365 = vmatmul.mubr.f32.gmra.mrb[162].mxu0 %v1715_v7 }
 0x252   : > { %v1716_v11 = vmax.f32 %v1542_v9, 0.0 }
 0x253   : > { %v1546_v12 = vpop.f32.mrb[74].mxu1 }
 0x254   : > { %v1547_v13 = vadd.f32 %v4249_v41, %v1546_v12  ;;  %v1548_v14 = vpop.f32.mrb[75].mxu1  ;;  %3367 = vmatprep.mubr.f32.mxu0 %v1716_v11 }
 0x256   : > { %v1717_v15 = vmax.f32 %v1547_v13, 0.0 }
 0x257   : > { %v1551_v16 = vpop.f32.mrb[76].mxu1 }
 0x258   : > { %v1552_v5 = vadd.f32 %v4249_v41, %v1551_v16  ;;  %v1553_v17 = vpop.f32.mrb[77].mxu1  ;;  %3368 = vmatmul.mubr.f32.gmra.mrb[164].mxu0 %v1717_v15 }
 0x25a   : > { %v1718_v18 = vmax.f32 %v1552_v5, 0.0 }
 0x25b   : > { %v1556_v19 = vpop.f32.mrb[78].mxu1 }
 0x25c   : > { %v1557_v20 = vadd.f32 %v4249_v41, %v1556_v19  ;;  %v1558_v21 = vpop.f32.mrb[79].mxu1  ;;  %3370 = vmatprep.mubr.f32.mxu0 %v1718_v18 }
 0x25e   : > { %v1719_v22 = vmax.f32 %v1557_v20, 0.0 }
 0x25f   : > { %v1561_v54 = vpop.f32.mrb[80].mxu1 }
 0x260   : > { %v1562_v23 = vadd.f32 %v4249_v41, %v1561_v54  ;;  %v1563_v56 = vpop.f32.mrb[81].mxu1  ;;  %3371 = vmatmul.mubr.f32.gmra.mrb[166].mxu0 %v1719_v22 }
 0x262   : > { %v1720_v24 = vmax.f32 %v1562_v23, 0.0 }
 0x263   : > { %v1566_v25 = vpop.f32.mrb[82].mxu1 }
 0x264   : > { %v1567_v26 = vadd.f32 %v4249_v41, %v1566_v25  ;;  %v1568_v27 = vpop.f32.mrb[83].mxu1  ;;  %3373 = vmatprep.mubr.f32.mxu0 %v1720_v24 }
 0x266   : > { %v1721_v28 = vmax.f32 %v1567_v26, 0.0 }
 0x267   : > { %v1571_v29 = vpop.f32.mrb[84].mxu1 }
 0x268   : > { %v1572_v30 = vadd.f32 %v4249_v41, %v1571_v29  ;;  %v1573_v31 = vpop.f32.mrb[85].mxu1  ;;  %3374 = vmatmul.mubr.f32.gmra.mrb[168].mxu0 %v1721_v28 }
 0x26a   : > { %v1722_v32 = vmax.f32 %v1572_v30, 0.0 }
 0x26b   : > { %v1576_v33 = vpop.f32.mrb[86].mxu1 }
 0x26c   : > { %v1577_v34 = vadd.f32 %v4249_v41, %v1576_v33  ;;  %v1578_v35 = vpop.f32.mrb[87].mxu1  ;;  %3376 = vmatprep.mubr.f32.mxu0 %v1722_v32 }
 0x26e   : > { %v1723_v36 = vmax.f32 %v1577_v34, 0.0 }
 0x26f   : > { %v1581_v37 = vpop.f32.mrb[88].mxu1 }
 0x270   : > { %v1582_v38 = vadd.f32 %v4249_v41, %v1581_v37  ;;  %v1583_v39 = vpop.f32.mrb[89].mxu1  ;;  %3377 = vmatmul.mubr.f32.gmra.mrb[170].mxu0 %v1723_v36 }
 0x272   : > { %v1724_v40 = vmax.f32 %v1582_v38, 0.0 }
 0x273   : > { %v1586_v42 = vpop.f32.mrb[90].mxu1 }
 0x274   : > { %v1587_v43 = vadd.f32 %v4249_v41, %v1586_v42  ;;  %v1588_v44 = vpop.f32.mrb[91].mxu1  ;;  %3379 = vmatprep.mubr.f32.mxu0 %v1724_v40 }
 0x276   : > { %v1725_v45 = vmax.f32 %v1587_v43, 0.0 }
 0x277   : > { %v1591_v46 = vpop.f32.mrb[92].mxu1 }
 0x278   : > { %v1592_v47 = vadd.f32 %v4249_v41, %v1591_v46  ;;  %v1593_v48 = vpop.f32.mrb[93].mxu1  ;;  %3380 = vmatmul.mubr.f32.gmra.mrb[172].mxu0 %v1725_v45 }
 0x27a   : > { %v1726_v49 = vmax.f32 %v1592_v47, 0.0 }
 0x27b   : > { %v1596_v50 = vpop.f32.mrb[94].mxu1 }
 0x27c   : > { %v1597_v51 = vadd.f32 %v4249_v41, %v1596_v50  ;;  %v1598_v52 = vpop.f32.mrb[95].mxu1  ;;  %3382 = vmatprep.mubr.f32.mxu0 %v1726_v49 }
 0x27e   : > { %v1727_v53 = vmax.f32 %v1597_v51, 0.0 }
 0x27f   : > { %v1601_v55 = vpop.f32.mrb[96].mxu1 }
 0x280   : > { %v1602_v57 = vadd.f32 %v4249_v41, %v1601_v55  ;;  %v1603_v58 = vpop.f32.mrb[97].mxu1  ;;  %3383 = vmatmul.mubr.f32.gmra.mrb[174].mxu0 %v1727_v53 }
 0x281   : > { %v4342_v58 = vld [vmem:[%s4694_s6] ss:$0 sm:$0xff] }
 0x282   : > { %v1728_v59 = vmax.f32 %v1602_v57, 0.0 }
 0x283   : > { %v1606_v60 = vpop.f32.mrb[98].mxu1 }
 0x284   : > { %v1607_v61 = vadd.f32 %v4249_v41, %v1606_v60  ;;  %v1608_v62 = vpop.f32.mrb[99].mxu1  ;;  %3385 = vmatprep.mubr.f32.mxu0 %v1728_v59 }
 0x286   : > { %v1729_v63 = vmax.f32 %v1607_v61, 0.0 }
 0x287   : > { %v1611_v0 = vpop.f32.mrb[100].mxu1 }
 0x288   : > { %v1612_v1 = vadd.f32 %v4249_v41, %v1611_v0  ;;  %v1613_v2 = vpop.f32.mrb[101].mxu1  ;;  %3386 = vmatmul.mubr.f32.gmra.mrb[176].mxu0 %v1729_v63 }
 0x28a   : > { %v1730_v3 = vmax.f32 %v1612_v1, 0.0 }
 0x28b   : > { %v1616_v4 = vpop.f32.mrb[102].mxu1 }
 0x28c   : > { %v1617_v6 = vadd.f32 %v4249_v41, %v1616_v4  ;;  %v1618_v7 = vpop.f32.mrb[103].mxu1  ;;  %3388 = vmatprep.mubr.f32.mxu0 %v1730_v3 }
 0x28e   : > { %v1731_v8 = vmax.f32 %v1617_v6, 0.0 }
 0x28f   : > { %v1621_v9 = vpop.f32.mrb[104].mxu1 }
 0x290   : > { %v1622_v10 = vadd.f32 %v4249_v41, %v1621_v9  ;;  %v1623_v11 = vpop.f32.mrb[105].mxu1  ;;  %3389 = vmatmul.mubr.f32.gmra.mrb[178].mxu0 %v1731_v8 }
 0x292   : > { %v1732_v12 = vmax.f32 %v1622_v10, 0.0 }
 0x293   : > { %v1626_v13 = vpop.f32.mrb[106].mxu1 }
 0x294   : > { %v1627_v14 = vadd.f32 %v4249_v41, %v1626_v13  ;;  %v1628_v15 = vpop.f32.mrb[107].mxu1  ;;  %3391 = vmatprep.mubr.f32.mxu0 %v1732_v12 }
 0x296   : > { %v1733_v16 = vmax.f32 %v1627_v14, 0.0 }
 0x297   : > { %v1631_v5 = vpop.f32.mrb[108].mxu1 }
 0x298   : > { %v1632_v17 = vadd.f32 %v4249_v41, %v1631_v5  ;;  %v1633_v18 = vpop.f32.mrb[109].mxu1  ;;  %3392 = vmatmul.mubr.f32.gmra.mrb[180].mxu0 %v1733_v16 }
 0x29a   : > { %v1734_v19 = vmax.f32 %v1632_v17, 0.0 }
 0x29b   : > { %v1636_v20 = vpop.f32.mrb[110].mxu1  ;;  %v3315_v21 = vpop.f32.mrb[128].mxu0 }
 0x29c   : > { %v1637_v22 = vadd.f32 %v4249_v41, %v1636_v20  ;;  %v1638_v54 = vpop.f32.mrb[111].mxu1  ;;  %v1833_v23 = vpop.f32.mrb[129].mxu0  ;;  %3394 = vmatprep.mubr.f32.mxu0 %v1734_v19  ;;  %v1839_v4 = vadd.f32 %v3315_v21, %v4342_v58 }
 0x29d   : > { %v1834_v62 = vadd.f32 %v4342_v58, %v1833_v23 }
 0x29e   : > { %v1735_v56 = vmax.f32 %v1637_v22, 0.0  ;;  %v2153_v9 = vmax.f32 %v1839_v4, 0.0 }
 0x29f   : > { %v1641_v24 = vpop.f32.mrb[112].mxu1  ;;  %v2152_v7 = vmax.f32 %v1834_v62, 0.0 }
 0x2a0   : > { %v1642_v25 = vadd.f32 %v4249_v41, %v1641_v24  ;;  %v1643_v26 = vpop.f32.mrb[113].mxu1  ;;  %3395 = vmatmul.mubr.f32.gmra.mrb[182].mxu0 %v1735_v56 }
 0x2a2   : > { %v1736_v27 = vmax.f32 %v1642_v25, 0.0 }
 0x2a3   : > { %v1646_v28 = vpop.f32.mrb[114].mxu1  ;;  %v3318_v29 = vpop.f32.mrb[130].mxu0 }
 0x2a4   : > { %v1647_v30 = vadd.f32 %v4249_v41, %v1646_v28  ;;  %v1648_v31 = vpop.f32.mrb[115].mxu1  ;;  %v1843_v32 = vpop.f32.mrb[131].mxu0  ;;  %3397 = vmatprep.mubr.f32.mxu0 %v1736_v27  ;;  %v1849_v10 = vadd.f32 %v3318_v29, %v4342_v58 }
 0x2a5   : > { %v1844_v8 = vadd.f32 %v4342_v58, %v1843_v32 }
 0x2a6   : > { %v1737_v33 = vmax.f32 %v1647_v30, 0.0  ;;  %v2155_v14 = vmax.f32 %v1849_v10, 0.0 }
 0x2a7   : > { %v1651_v34 = vpop.f32.mrb[116].mxu1  ;;  %v2154_v11 = vmax.f32 %v1844_v8, 0.0 }
 0x2a8   : > { %v1652_v35 = vadd.f32 %v4249_v41, %v1651_v34  ;;  %v1653_v36 = vpop.f32.mrb[117].mxu1  ;;  %3398 = vmatmul.mubr.f32.gmra.mrb[184].mxu0 %v1737_v33 }
 0x2aa   : > { %v1738_v37 = vmax.f32 %v1652_v35, 0.0 }
 0x2ab   : > { %v1656_v38 = vpop.f32.mrb[118].mxu1  ;;  %v3321_v39 = vpop.f32.mrb[132].mxu0 }
 0x2ac   : > { %v1657_v40 = vadd.f32 %v4249_v41, %v1656_v38  ;;  %v1658_v42 = vpop.f32.mrb[119].mxu1  ;;  %v1853_v43 = vpop.f32.mrb[133].mxu0  ;;  %3400 = vmatprep.mubr.f32.mxu0 %v1738_v37  ;;  %v1859_v15 = vadd.f32 %v3321_v39, %v4342_v58 }
 0x2ad   : > { %v1854_v12 = vadd.f32 %v4342_v58, %v1853_v43 }
 0x2ae   : > { %v1739_v44 = vmax.f32 %v1657_v40, 0.0  ;;  %v2157_v17 = vmax.f32 %v1859_v15, 0.0 }
 0x2af   : > { %v1661_v45 = vpop.f32.mrb[120].mxu1  ;;  %v2156_v16 = vmax.f32 %v1854_v12, 0.0 }
 0x2b0   : > { %v1662_v46 = vadd.f32 %v4249_v41, %v1661_v45  ;;  %v1663_v47 = vpop.f32.mrb[121].mxu1  ;;  %3401 = vmatmul.mubr.f32.gmra.mrb[186].mxu0 %v1739_v44 }
 0x2b2   : > { %v1740_v48 = vmax.f32 %v1662_v46, 0.0 }
 0x2b3   : > { %v1666_v49 = vpop.f32.mrb[122].mxu1  ;;  %v3324_v50 = vpop.f32.mrb[134].mxu0 }
 0x2b4   : > { %v1667_v51 = vadd.f32 %v4249_v41, %v1666_v49  ;;  %v1668_v52 = vpop.f32.mrb[123].mxu1  ;;  %v1863_v53 = vpop.f32.mrb[135].mxu0  ;;  %3403 = vmatprep.mubr.f32.mxu0 %v1740_v48  ;;  %v1869_v18 = vadd.f32 %v3324_v50, %v4342_v58 }
 0x2b5   : > { %v1864_v5 = vadd.f32 %v4342_v58, %v1863_v53 }
 0x2b6   : > { %v1741_v55 = vmax.f32 %v1667_v51, 0.0  ;;  %v2159_v54 = vmax.f32 %v1869_v18, 0.0 }
 0x2b7   : > { %v1671_v57 = vpop.f32.mrb[124].mxu1  ;;  %v2158_v19 = vmax.f32 %v1864_v5, 0.0 }
 0x2b8   : > { %v1672_v59 = vadd.f32 %v4249_v41, %v1671_v57  ;;  %v1673_v60 = vpop.f32.mrb[125].mxu1  ;;  %3404 = vmatmul.mubr.f32.gmra.mrb[188].mxu0 %v1741_v55 }
 0x2ba   : > { %v1742_v61 = vmax.f32 %v1672_v59, 0.0 }
 0x2bb   : > { %v1676_v63 = vpop.f32.mrb[126].mxu1  ;;  %v3327_v0 = vpop.f32.mrb[136].mxu0 }
 0x2bc   : > { %v1677_v1 = vadd.f32 %v4249_v41, %v1676_v63  ;;  %v1678_v2 = vpop.f32.mrb[127].mxu1  ;;  %v1873_v3 = vpop.f32.mrb[137].mxu0  ;;  %3406 = vmatprep.mubr.f32.mxu0 %v1742_v61  ;;  %v1879_v23 = vadd.f32 %v3327_v0, %v4342_v58 }
 0x2bd   : > { %v1874_v20 = vadd.f32 %v4342_v58, %v1873_v3 }
 0x2be   : > { %v1743_v6 = vmax.f32 %v1677_v1, 0.0  ;;  %v2161_v25 = vmax.f32 %v1879_v23, 0.0 }
 0x2bf   : > { %v2160_v56 = vmax.f32 %v1874_v20, 0.0 }
 0x2c0   : > { %3407 = vmatmul.mubr.f32.gmra.mrb[190].mxu0 %v1743_v6 }
 0x2c1   : > { %3425 = vmatprep.mubr.msk.f32.mxu0 %vm2231_vm1, %v2152_v7 }
 0x2c3   : > { %v3330_v41 = vpop.f32.mrb[138].mxu0 }
 0x2c4   : > { %v1883_v13 = vpop.f32.mrb[139].mxu0  ;;  %3426 = vmatmul.mubr.msk.f32.vlgmr.msra.gmra.mrb[192].mxu0 %vm2231_vm1, %v2153_v9  ;;  %v1889_v26 = vadd.f32 %v3330_v41, %v4342_v58 }
 0x2c5   : > { %3428 = vmatprep.mubr.msk.f32.mxu0 %vm2231_vm1, %v2154_v11  ;;  %v1884_v24 = vadd.f32 %v4342_v58, %v1883_v13 }
 0x2c6   : > { %v2163_v33 = vmax.f32 %v1889_v26, 0.0 }
 0x2c7   : > { %v2162_v27 = vmax.f32 %v1884_v24, 0.0 }
 0x2c8   : > { %3429 = vmatmul.mubr.msk.f32.gmra.mrb[194].mxu0 %vm2231_vm1, %v2155_v14 }
 0x2c9   : > { %3431 = vmatprep.mubr.msk.f32.mxu0 %vm2231_vm1, %v2156_v16 }
 0x2cb   : > { %v3333_v21 = vpop.f32.mrb[140].mxu0 }
 0x2cc   : > { %v1893_v22 = vpop.f32.mrb[141].mxu0  ;;  %3432 = vmatmul.mubr.msk.f32.gmra.mrb[196].mxu0 %vm2231_vm1, %v2157_v17  ;;  %v1899_v34 = vadd.f32 %v3333_v21, %v4342_v58 }
 0x2cd   : > { %3434 = vmatprep.mubr.msk.f32.mxu0 %vm2231_vm1, %v2158_v19  ;;  %v1894_v28 = vadd.f32 %v4342_v58, %v1893_v22 }
 0x2ce   : > { %v2165_v38 = vmax.f32 %v1899_v34, 0.0 }
 0x2cf   : > { %v2164_v35 = vmax.f32 %v1894_v28, 0.0 }
 0x2d0   : > { %3435 = vmatmul.mubr.msk.f32.gmra.mrb[198].mxu0 %vm2231_vm1, %v2159_v54 }
 0x2d1   : > { %3437 = vmatprep.mubr.msk.f32.mxu0 %vm2231_vm1, %v2160_v56 }
 0x2d3   : > { %v3336_v29 = vpop.f32.mrb[142].mxu0 }
 0x2d4   : > { %v1909_v30 = vadd.f32 %v3336_v29, %v4342_v58  ;;  %v1903_v31 = vpop.f32.mrb[143].mxu0  ;;  %3438 = vmatmul.mubr.msk.f32.gmra.mrb[200].mxu0 %vm2231_vm1, %v2161_v25 }
 0x2d5   : > { %v1904_v32 = vadd.f32 %v4342_v58, %v1903_v31  ;;  %3440 = vmatprep.mubr.msk.f32.mxu0 %vm2231_vm1, %v2162_v27 }
 0x2d6   : > { %v2167_v37 = vmax.f32 %v1909_v30, 0.0 }
 0x2d7   : > { %v2166_v36 = vmax.f32 %v1904_v32, 0.0 }
 0x2d8   : > { %3441 = vmatmul.mubr.msk.f32.gmra.mrb[202].mxu0 %vm2231_vm1, %v2163_v33 }
 0x2d9   : > { %3443 = vmatprep.mubr.msk.f32.mxu0 %vm2231_vm1, %v2164_v35  ;;  %3446 = vmatprep.mubr.msk.f32.mxu1 %vm2231_vm1, %v2166_v36 }
 0x2da   : > { %3447 = vmatmul.mubr.msk.f32.vlgmr.msra.gmra.mrb[128].mxu1 %vm2231_vm1, %v2167_v37 }
 0x2db   : > { %v3339_v39 = vpop.f32.mrb[144].mxu0 }
 0x2dc   : > { %v1919_v40 = vadd.f32 %v3339_v39, %v4342_v58  ;;  %v1913_v42 = vpop.f32.mrb[145].mxu0  ;;  %3444 = vmatmul.mubr.msk.f32.gmra.mrb[204].mxu0 %vm2231_vm1, %v2165_v38 }
 0x2dd   : > { %v1914_v43 = vadd.f32 %v4342_v58, %v1913_v42 }
 0x2de   : > { %v2169_v45 = vmax.f32 %v1919_v40, 0.0 }
 0x2df   : > { %v2168_v44 = vmax.f32 %v1914_v43, 0.0 }
 0x2e1   : > { %3449 = vmatprep.mubr.msk.f32.mxu1 %vm2231_vm1, %v2168_v44 }
 0x2e2   : > { %3450 = vmatmul.mubr.msk.f32.gmra.mrb[130].mxu1 %vm2231_vm1, %v2169_v45 }
 0x2e3   : > { %v3342_v46 = vpop.f32.mrb[146].mxu0 }
 0x2e4   : > { %v1929_v47 = vadd.f32 %v3342_v46, %v4342_v58  ;;  %v1923_v48 = vpop.f32.mrb[147].mxu0 }
 0x2e5   : > { %v1924_v49 = vadd.f32 %v4342_v58, %v1923_v48 }
 0x2e6   : > { %v2171_v51 = vmax.f32 %v1929_v47, 0.0 }
 0x2e7   : > { %v2170_v50 = vmax.f32 %v1924_v49, 0.0 }
 0x2e9   : > { %3452 = vmatprep.mubr.msk.f32.mxu1 %vm2231_vm1, %v2170_v50 }
 0x2ea   : > { %3453 = vmatmul.mubr.msk.f32.gmra.mrb[132].mxu1 %vm2231_vm1, %v2171_v51 }
 0x2eb   : > { %v3345_v52 = vpop.f32.mrb[148].mxu0 }
 0x2ec   : > { %v1939_v53 = vadd.f32 %v3345_v52, %v4342_v58  ;;  %v1933_v55 = vpop.f32.mrb[149].mxu0 }
 0x2ed   : > { %v1934_v57 = vadd.f32 %v4342_v58, %v1933_v55 }
 0x2ee   : > { %v2173_v60 = vmax.f32 %v1939_v53, 0.0 }
 0x2ef   : > { %v2172_v59 = vmax.f32 %v1934_v57, 0.0 }
 0x2f1   : > { %3455 = vmatprep.mubr.msk.f32.mxu1 %vm2231_vm1, %v2172_v59 }
 0x2f2   : > { %3456 = vmatmul.mubr.msk.f32.gmra.mrb[134].mxu1 %vm2231_vm1, %v2173_v60 }
 0x2f3   : > { %v3348_v61 = vpop.f32.mrb[150].mxu0 }
 0x2f4   : > { %v1949_v62 = vadd.f32 %v3348_v61, %v4342_v58  ;;  %v1943_v63 = vpop.f32.mrb[151].mxu0 }
 0x2f5   : > { %v1944_v0 = vadd.f32 %v4342_v58, %v1943_v63 }
 0x2f6   : > { %v2175_v2 = vmax.f32 %v1949_v62, 0.0 }
 0x2f7   : > { %v2174_v1 = vmax.f32 %v1944_v0, 0.0 }
 0x2f9   : > { %3458 = vmatprep.mubr.msk.f32.mxu1 %vm2231_vm1, %v2174_v1 }
 0x2fa   : > { %3459 = vmatmul.mubr.msk.f32.gmra.mrb[136].mxu1 %vm2231_vm1, %v2175_v2 }
 0x2fb   : > { %v3351_v3 = vpop.f32.mrb[152].mxu0 }
 0x2fc   : > { %v1959_v4 = vadd.f32 %v3351_v3, %v4342_v58  ;;  %v1953_v6 = vpop.f32.mrb[153].mxu0 }
 0x2fd   : > { %v1954_v7 = vadd.f32 %v4342_v58, %v1953_v6 }
 0x2fe   : > { %v2177_v9 = vmax.f32 %v1959_v4, 0.0 }
 0x2ff   : > { %v2176_v8 = vmax.f32 %v1954_v7, 0.0 }
 0x301   : > { %3461 = vmatprep.mubr.msk.f32.mxu1 %vm2231_vm1, %v2176_v8 }
 0x302   : > { %3462 = vmatmul.mubr.msk.f32.gmra.mrb[138].mxu1 %vm2231_vm1, %v2177_v9 }
 0x303   : > { %v3354_v10 = vpop.f32.mrb[154].mxu0 }
 0x304   : > { %v1969_v11 = vadd.f32 %v3354_v10, %v4342_v58  ;;  %v1963_v12 = vpop.f32.mrb[155].mxu0 }
 0x305   : > { %v1964_v41 = vadd.f32 %v4342_v58, %v1963_v12 }
 0x306   : > { %v2179_v14 = vmax.f32 %v1969_v11, 0.0 }
 0x307   : > { %v2178_v13 = vmax.f32 %v1964_v41, 0.0 }
 0x309   : > { %3464 = vmatprep.mubr.msk.f32.mxu1 %vm2231_vm1, %v2178_v13 }
 0x30a   : > { %3465 = vmatmul.mubr.msk.f32.gmra.mrb[140].mxu1 %vm2231_vm1, %v2179_v14 }
 0x30b   : > { %v3357_v15 = vpop.f32.mrb[156].mxu0 }
 0x30c   : > { %v1979_v16 = vadd.f32 %v3357_v15, %v4342_v58  ;;  %v1973_v5 = vpop.f32.mrb[157].mxu0 }
 0x30d   : > { %v1974_v17 = vadd.f32 %v4342_v58, %v1973_v5 }
 0x30e   : > { %v2181_v19 = vmax.f32 %v1979_v16, 0.0 }
 0x30f   : > { %v2180_v18 = vmax.f32 %v1974_v17, 0.0 }
 0x311   : > { %3467 = vmatprep.mubr.msk.f32.mxu1 %vm2231_vm1, %v2180_v18 }
 0x312   : > { %3468 = vmatmul.mubr.msk.f32.gmra.mrb[142].mxu1 %vm2231_vm1, %v2181_v19 }
 0x313   : > { %v3360_v20 = vpop.f32.mrb[158].mxu0 }
 0x314   : > { %v1989_v21 = vadd.f32 %v3360_v20, %v4342_v58  ;;  %v1983_v22 = vpop.f32.mrb[159].mxu0 }
 0x315   : > { %v1984_v54 = vadd.f32 %v4342_v58, %v1983_v22 }
 0x316   : > { %v2183_v56 = vmax.f32 %v1989_v21, 0.0 }
 0x317   : > { %v2182_v23 = vmax.f32 %v1984_v54, 0.0 }
 0x319   : > { %3470 = vmatprep.mubr.msk.f32.mxu1 %vm2231_vm1, %v2182_v23 }
 0x31a   : > { %3471 = vmatmul.mubr.msk.f32.gmra.mrb[144].mxu1 %vm2231_vm1, %v2183_v56 }
 0x31b   : > { %v3363_v24 = vpop.f32.mrb[160].mxu0 }
 0x31c   : > { %v1999_v25 = vadd.f32 %v3363_v24, %v4342_v58  ;;  %v1993_v26 = vpop.f32.mrb[161].mxu0 }
 0x31d   : > { %v1994_v27 = vadd.f32 %v4342_v58, %v1993_v26 }
 0x31e   : > { %v2185_v29 = vmax.f32 %v1999_v25, 0.0 }
 0x31f   : > { %v2184_v28 = vmax.f32 %v1994_v27, 0.0 }
 0x321   : > { %3473 = vmatprep.mubr.msk.f32.mxu1 %vm2231_vm1, %v2184_v28 }
 0x322   : > { %3474 = vmatmul.mubr.msk.f32.gmra.mrb[146].mxu1 %vm2231_vm1, %v2185_v29 }
 0x323   : > { %v3366_v30 = vpop.f32.mrb[162].mxu0 }
 0x324   : > { %v2009_v31 = vadd.f32 %v3366_v30, %v4342_v58  ;;  %v2003_v32 = vpop.f32.mrb[163].mxu0 }
 0x325   : > { %v2004_v33 = vadd.f32 %v4342_v58, %v2003_v32 }
 0x326   : > { %v2187_v35 = vmax.f32 %v2009_v31, 0.0 }
 0x327   : > { %v2186_v34 = vmax.f32 %v2004_v33, 0.0 }
 0x329   : > { %3476 = vmatprep.mubr.msk.f32.mxu1 %vm2231_vm1, %v2186_v34 }
 0x32a   : > { %3477 = vmatmul.mubr.msk.f32.gmra.mrb[148].mxu1 %vm2231_vm1, %v2187_v35 }
 0x32b   : > { %v3369_v36 = vpop.f32.mrb[164].mxu0 }
 0x32c   : > { %v2019_v37 = vadd.f32 %v3369_v36, %v4342_v58  ;;  %v2013_v38 = vpop.f32.mrb[165].mxu0 }
 0x32d   : > { %v2014_v39 = vadd.f32 %v4342_v58, %v2013_v38 }
 0x32e   : > { %v2189_v42 = vmax.f32 %v2019_v37, 0.0 }
 0x32f   : > { %v2188_v40 = vmax.f32 %v2014_v39, 0.0 }
 0x331   : > { %3479 = vmatprep.mubr.msk.f32.mxu1 %vm2231_vm1, %v2188_v40 }
 0x332   : > { %3480 = vmatmul.mubr.msk.f32.gmra.mrb[150].mxu1 %vm2231_vm1, %v2189_v42 }
 0x333   : > { %v3372_v43 = vpop.f32.mrb[166].mxu0 }
 0x334   : > { %v2029_v44 = vadd.f32 %v3372_v43, %v4342_v58  ;;  %v2023_v45 = vpop.f32.mrb[167].mxu0 }
 0x335   : > { %v2024_v46 = vadd.f32 %v4342_v58, %v2023_v45 }
 0x336   : > { %v2191_v48 = vmax.f32 %v2029_v44, 0.0 }
 0x337   : > { %v2190_v47 = vmax.f32 %v2024_v46, 0.0 }
 0x339   : > { %3482 = vmatprep.mubr.msk.f32.mxu1 %vm2231_vm1, %v2190_v47 }
 0x33a   : > { %3483 = vmatmul.mubr.msk.f32.gmra.mrb[152].mxu1 %vm2231_vm1, %v2191_v48 }
 0x33b   : > { %v3375_v49 = vpop.f32.mrb[168].mxu0 }
 0x33c   : > { %v2039_v50 = vadd.f32 %v3375_v49, %v4342_v58  ;;  %v2033_v51 = vpop.f32.mrb[169].mxu0 }
 0x33d   : > { %v2034_v52 = vadd.f32 %v4342_v58, %v2033_v51 }
 0x33e   : > { %v2193_v55 = vmax.f32 %v2039_v50, 0.0 }
 0x33f   : > { %v2192_v53 = vmax.f32 %v2034_v52, 0.0 }
 0x341   : > { %3485 = vmatprep.mubr.msk.f32.mxu1 %vm2231_vm1, %v2192_v53 }
 0x342   : > { %3486 = vmatmul.mubr.msk.f32.gmra.mrb[154].mxu1 %vm2231_vm1, %v2193_v55 }
 0x343   : > { %v3378_v57 = vpop.f32.mrb[170].mxu0 }
 0x344   : > { %v2049_v59 = vadd.f32 %v3378_v57, %v4342_v58  ;;  %v2043_v60 = vpop.f32.mrb[171].mxu0 }
 0x345   : > { %v2044_v61 = vadd.f32 %v4342_v58, %v2043_v60 }
 0x346   : > { %v2195_v63 = vmax.f32 %v2049_v59, 0.0  ;;  %v4476_v59 = vld [vmem:[%s395_s26] ss:$0 sm:$0xff] }
 0x347   : > { %v2194_v62 = vmax.f32 %v2044_v61, 0.0 }
 0x349   : > { %3488 = vmatprep.mubr.msk.f32.mxu1 %vm2231_vm1, %v2194_v62 }
 0x34a   : > { %3489 = vmatmul.mubr.msk.f32.gmra.mrb[156].mxu1 %vm2231_vm1, %v2195_v63 }
 0x34b   : > { %v3381_v0 = vpop.f32.mrb[172].mxu0 }
 0x34c   : > { %v2059_v1 = vadd.f32 %v3381_v0, %v4342_v58  ;;  %v2053_v2 = vpop.f32.mrb[173].mxu0 }
 0x34d   : > { %v2054_v3 = vadd.f32 %v4342_v58, %v2053_v2 }
 0x34e   : > { %v2197_v6 = vmax.f32 %v2059_v1, 0.0 }
 0x34f   : > { %v2196_v4 = vmax.f32 %v2054_v3, 0.0 }
 0x351   : > { %3491 = vmatprep.mubr.msk.f32.mxu1 %vm2231_vm1, %v2196_v4 }
 0x352   : > { %3492 = vmatmul.mubr.msk.f32.gmra.mrb[158].mxu1 %vm2231_vm1, %v2197_v6 }
 0x353   : > { %v3384_v7 = vpop.f32.mrb[174].mxu0 }
 0x354   : > { %v2069_v8 = vadd.f32 %v3384_v7, %v4342_v58  ;;  %v2063_v9 = vpop.f32.mrb[175].mxu0 }
 0x355   : > { %v2064_v10 = vadd.f32 %v4342_v58, %v2063_v9 }
 0x356   : > { %v2199_v12 = vmax.f32 %v2069_v8, 0.0 }
 0x357   : > { %v2198_v11 = vmax.f32 %v2064_v10, 0.0 }
 0x359   : > { %3494 = vmatprep.mubr.msk.f32.mxu1 %vm2231_vm1, %v2198_v11 }
 0x35a   : > { %3495 = vmatmul.mubr.msk.f32.gmra.mrb[160].mxu1 %vm2231_vm1, %v2199_v12 }
 0x35b   : > { %v3387_v41 = vpop.f32.mrb[176].mxu0 }
 0x35c   : > { %v2079_v13 = vadd.f32 %v3387_v41, %v4342_v58  ;;  %v2073_v14 = vpop.f32.mrb[177].mxu0 }
 0x35d   : > { %v2074_v15 = vadd.f32 %v4342_v58, %v2073_v14 }
 0x35e   : > { %v2201_v5 = vmax.f32 %v2079_v13, 0.0 }
 0x35f   : > { %v2200_v16 = vmax.f32 %v2074_v15, 0.0 }
 0x361   : > { %3497 = vmatprep.mubr.msk.f32.mxu1 %vm2231_vm1, %v2200_v16 }
 0x362   : > { %3498 = vmatmul.mubr.msk.f32.gmra.mrb[162].mxu1 %vm2231_vm1, %v2201_v5 }
 0x363   : > { %v3390_v17 = vpop.f32.mrb[178].mxu0 }
 0x364   : > { %v2089_v18 = vadd.f32 %v3390_v17, %v4342_v58  ;;  %v2083_v19 = vpop.f32.mrb[179].mxu0 }
 0x365   : > { %v2084_v20 = vadd.f32 %v4342_v58, %v2083_v19 }
 0x366   : > { %v2203_v22 = vmax.f32 %v2089_v18, 0.0 }
 0x367   : > { %v2202_v21 = vmax.f32 %v2084_v20, 0.0 }
 0x369   : > { %3500 = vmatprep.mubr.msk.f32.mxu1 %vm2231_vm1, %v2202_v21 }
 0x36a   : > { %3501 = vmatmul.mubr.msk.f32.gmra.mrb[164].mxu1 %vm2231_vm1, %v2203_v22 }
 0x36b   : > { %v3393_v54 = vpop.f32.mrb[180].mxu0 }
 0x36c   : > { %v2099_v23 = vadd.f32 %v3393_v54, %v4342_v58  ;;  %v2093_v56 = vpop.f32.mrb[181].mxu0 }
 0x36d   : > { %v2094_v24 = vadd.f32 %v4342_v58, %v2093_v56 }
 0x36e   : > { %v2205_v26 = vmax.f32 %v2099_v23, 0.0 }
 0x36f   : > { %v2204_v25 = vmax.f32 %v2094_v24, 0.0 }
 0x371   : > { %3503 = vmatprep.mubr.msk.f32.mxu1 %vm2231_vm1, %v2204_v25 }
 0x372   : > { %3504 = vmatmul.mubr.msk.f32.gmra.mrb[166].mxu1 %vm2231_vm1, %v2205_v26 }
 0x373   : > { %v3396_v27 = vpop.f32.mrb[182].mxu0 }
 0x374   : > { %v2109_v28 = vadd.f32 %v3396_v27, %v4342_v58  ;;  %v2103_v29 = vpop.f32.mrb[183].mxu0 }
 0x375   : > { %v2104_v30 = vadd.f32 %v4342_v58, %v2103_v29 }
 0x376   : > { %v2207_v32 = vmax.f32 %v2109_v28, 0.0 }
 0x377   : > { %v2206_v31 = vmax.f32 %v2104_v30, 0.0 }
 0x379   : > { %3506 = vmatprep.mubr.msk.f32.mxu1 %vm2231_vm1, %v2206_v31 }
 0x37a   : > { %3507 = vmatmul.mubr.msk.f32.gmra.mrb[168].mxu1 %vm2231_vm1, %v2207_v32 }
 0x37b   : > { %v3399_v33 = vpop.f32.mrb[184].mxu0 }
 0x37c   : > { %v2119_v34 = vadd.f32 %v3399_v33, %v4342_v58  ;;  %v2113_v35 = vpop.f32.mrb[185].mxu0 }
 0x37d   : > { %v2114_v36 = vadd.f32 %v4342_v58, %v2113_v35 }
 0x37e   : > { %v2209_v38 = vmax.f32 %v2119_v34, 0.0 }
 0x37f   : > { %v2208_v37 = vmax.f32 %v2114_v36, 0.0 }
 0x381   : > { %3509 = vmatprep.mubr.msk.f32.mxu1 %vm2231_vm1, %v2208_v37 }
 0x382   : > { %3510 = vmatmul.mubr.msk.f32.gmra.mrb[170].mxu1 %vm2231_vm1, %v2209_v38 }
 0x383   : > { %v3402_v39 = vpop.f32.mrb[186].mxu0 }
 0x384   : > { %v2129_v40 = vadd.f32 %v3402_v39, %v4342_v58  ;;  %v2123_v42 = vpop.f32.mrb[187].mxu0 }
 0x385   : > { %v2124_v43 = vadd.f32 %v4342_v58, %v2123_v42 }
 0x386   : > { %v2211_v45 = vmax.f32 %v2129_v40, 0.0 }
 0x387   : > { %v2210_v44 = vmax.f32 %v2124_v43, 0.0 }
 0x389   : > { %3512 = vmatprep.mubr.msk.f32.mxu1 %vm2231_vm1, %v2210_v44 }
 0x38a   : > { %3513 = vmatmul.mubr.msk.f32.gmra.mrb[172].mxu1 %vm2231_vm1, %v2211_v45 }
 0x38b   : > { %v3405_v46 = vpop.f32.mrb[188].mxu0 }
 0x38c   : > { %v2139_v47 = vadd.f32 %v3405_v46, %v4342_v58  ;;  %v2133_v48 = vpop.f32.mrb[189].mxu0 }
 0x38d   : > { %v2134_v49 = vadd.f32 %v4342_v58, %v2133_v48 }
 0x38e   : > { %v2213_v51 = vmax.f32 %v2139_v47, 0.0 }
 0x38f   : > { %v2212_v50 = vmax.f32 %v2134_v49, 0.0 }
 0x391   : > { %3515 = vmatprep.mubr.msk.f32.mxu1 %vm2231_vm1, %v2212_v50 }
 0x392   : > { %3516 = vmatmul.mubr.msk.f32.gmra.mrb[174].mxu1 %vm2231_vm1, %v2213_v51 }
 0x393   : > { %v3408_v52 = vpop.f32.mrb[190].mxu0 }
 0x394   : > { %v2149_v53 = vadd.f32 %v3408_v52, %v4342_v58  ;;  %v2143_v55 = vpop.f32.mrb[191].mxu0 }
 0x395   : > { %v2144_v57 = vadd.f32 %v4342_v58, %v2143_v55 }
 0x396   : > { %v2215_v62 = vmax.f32 %v2149_v53, 0.0 }
 0x397   : > { %v2214_v60 = vmax.f32 %v2144_v57, 0.0  ;;  %v3427_v61 = vpop.f32.mrb[192].mxu0 }
 0x398   : > { %v2496_v63 = vadd.f32 %v3427_v61, %v4476_v59  ;;  %v2490_v0 = vpop.f32.mrb[193].mxu0 }
 0x399   : > { %v2491_v58 = vadd.f32 %v4476_v59, %v2490_v0  ;;  %3518 = vmatprep.mubr.msk.f32.mxu1 %vm2231_vm1, %v2214_v60 }
 0x39a   : > { %2811 = vst.msk [vmem:[%s4483_s28 + $0x8] sm:$0xff] %vm2809_vm2, %v2496_v63  ;;  %3519 = vmatmul.mubr.msk.f32.gmra.mrb[176].mxu1 %vm2231_vm1, %v2215_v62 }
 0x39b   : > { %2810 = vst.msk [vmem:[%s4483_s28] sm:$0xff] %vm2809_vm2, %v2491_v58  ;;  %v3430_v1 = vpop.f32.mrb[194].mxu0 }
 0x39c   : > { %v2506_v2 = vadd.f32 %v3430_v1, %v4476_v59  ;;  %v2500_v3 = vpop.f32.mrb[195].mxu0 }
 0x39d   : > { %v2501_v4 = vadd.f32 %v4476_v59, %v2500_v3 }
 0x39e   : > { %2813 = vst.msk [vmem:[%s4483_s28 + $0x18] sm:$0xff] %vm2809_vm2, %v2506_v2 }
 0x39f   : > { %2812 = vst.msk [vmem:[%s4483_s28 + $0x10] sm:$0xff] %vm2809_vm2, %v2501_v4  ;;  %v3433_v6 = vpop.f32.mrb[196].mxu0 }
 0x3a0   : > { %v2516_v7 = vadd.f32 %v3433_v6, %v4476_v59  ;;  %v2510_v8 = vpop.f32.mrb[197].mxu0 }
 0x3a1   : > { %v2511_v9 = vadd.f32 %v4476_v59, %v2510_v8 }
 0x3a2   : > { %2815 = vst.msk [vmem:[%s4483_s28 + $0x28] sm:$0xff] %vm2809_vm2, %v2516_v7 }
 0x3a3   : > { %2814 = vst.msk [vmem:[%s4483_s28 + $0x20] sm:$0xff] %vm2809_vm2, %v2511_v9  ;;  %v3436_v10 = vpop.f32.mrb[198].mxu0 }
 0x3a4   : > { %v2526_v11 = vadd.f32 %v3436_v10, %v4476_v59  ;;  %v2520_v12 = vpop.f32.mrb[199].mxu0 }
 0x3a5   : > { %v2521_v41 = vadd.f32 %v4476_v59, %v2520_v12 }
 0x3a6   : > { %2817 = vst.msk [vmem:[%s4483_s28 + $0x38] sm:$0xff] %vm2809_vm2, %v2526_v11 }
 0x3a7   : > { %2816 = vst.msk [vmem:[%s4483_s28 + $0x30] sm:$0xff] %vm2809_vm2, %v2521_v41  ;;  %v3439_v13 = vpop.f32.mrb[200].mxu0 }
 0x3a8   : > { %v2536_v14 = vadd.f32 %v3439_v13, %v4476_v59  ;;  %v2530_v15 = vpop.f32.mrb[201].mxu0 }
 0x3a9   : > { %v2531_v16 = vadd.f32 %v4476_v59, %v2530_v15 }
 0x3aa   : > { %2819 = vst.msk [vmem:[%s4483_s28 + $0x48] sm:$0xff] %vm2809_vm2, %v2536_v14 }
 0x3ab   : > { %2818 = vst.msk [vmem:[%s4483_s28 + $0x40] sm:$0xff] %vm2809_vm2, %v2531_v16  ;;  %v3442_v5 = vpop.f32.mrb[202].mxu0 }
 0x3ac   : > { %v2546_v17 = vadd.f32 %v3442_v5, %v4476_v59  ;;  %v2540_v18 = vpop.f32.mrb[203].mxu0 }
 0x3ad   : > { %v2541_v19 = vadd.f32 %v4476_v59, %v2540_v18  ;;  %v3448_v20 = vpop.f32.mrb[128].mxu1 }
 0x3ae   : > { %2821 = vst.msk [vmem:[%s4483_s28 + $0x58] sm:$0xff] %vm2809_vm2, %v2546_v17  ;;  %v2566_v21 = vadd.f32 %v3448_v20, %v4476_v59  ;;  %v2560_v22 = vpop.f32.mrb[129].mxu1 }
 0x3af   : > { %2820 = vst.msk [vmem:[%s4483_s28 + $0x50] sm:$0xff] %vm2809_vm2, %v2541_v19  ;;  %v2561_v54 = vadd.f32 %v4476_v59, %v2560_v22  ;;  %v3445_v23 = vpop.f32.mrb[204].mxu0 }
 0x3b0   : > { %2825 = vst.msk [vmem:[%s4483_s28 + $0x78] sm:$0xff] %vm2809_vm2, %v2566_v21  ;;  %v2556_v56 = vadd.f32 %v3445_v23, %v4476_v59  ;;  %v2550_v24 = vpop.f32.mrb[205].mxu0 }
 0x3b1   : > { %2824 = vst.msk [vmem:[%s4483_s28 + $0x70] sm:$0xff] %vm2809_vm2, %v2561_v54  ;;  %v2551_v25 = vadd.f32 %v4476_v59, %v2550_v24 }
 0x3b2   : > { %2823 = vst.msk [vmem:[%s4483_s28 + $0x68] sm:$0xff] %vm2809_vm2, %v2556_v56 }
 0x3b3   : > { %2822 = vst.msk [vmem:[%s4483_s28 + $0x60] sm:$0xff] %vm2809_vm2, %v2551_v25 }
 0x3b5   : > { %v3451_v26 = vpop.f32.mrb[130].mxu1 }
 0x3b6   : > { %v2576_v27 = vadd.f32 %v3451_v26, %v4476_v59  ;;  %v2570_v28 = vpop.f32.mrb[131].mxu1 }
 0x3b7   : > { %v2571_v29 = vadd.f32 %v4476_v59, %v2570_v28 }
 0x3b8   : > { %2827 = vst.msk [vmem:[%s4483_s28 + $0x88] sm:$0xff] %vm2809_vm2, %v2576_v27 }
 0x3b9   : > { %2826 = vst.msk [vmem:[%s4483_s28 + $0x80] sm:$0xff] %vm2809_vm2, %v2571_v29 }
 0x3bd   : > { %v3454_v30 = vpop.f32.mrb[132].mxu1 }
 0x3be   : > { %v2586_v31 = vadd.f32 %v3454_v30, %v4476_v59  ;;  %v2580_v32 = vpop.f32.mrb[133].mxu1 }
 0x3bf   : > { %v2581_v33 = vadd.f32 %v4476_v59, %v2580_v32 }
 0x3c0   : > { %2829 = vst.msk [vmem:[%s4483_s28 + $0x98] sm:$0xff] %vm2809_vm2, %v2586_v31 }
 0x3c1   : > { %2828 = vst.msk [vmem:[%s4483_s28 + $0x90] sm:$0xff] %vm2809_vm2, %v2581_v33 }
 0x3c5   : > { %v3457_v34 = vpop.f32.mrb[134].mxu1 }
 0x3c6   : > { %v2596_v35 = vadd.f32 %v3457_v34, %v4476_v59  ;;  %v2590_v36 = vpop.f32.mrb[135].mxu1 }
 0x3c7   : > { %v2591_v37 = vadd.f32 %v4476_v59, %v2590_v36 }
 0x3c8   : > { %2831 = vst.msk [vmem:[%s4483_s28 + $0xa8] sm:$0xff] %vm2809_vm2, %v2596_v35 }
 0x3c9   : > { %2830 = vst.msk [vmem:[%s4483_s28 + $0xa0] sm:$0xff] %vm2809_vm2, %v2591_v37 }
 0x3cd   : > { %v3460_v38 = vpop.f32.mrb[136].mxu1 }
 0x3ce   : > { %v2606_v39 = vadd.f32 %v3460_v38, %v4476_v59  ;;  %v2600_v40 = vpop.f32.mrb[137].mxu1 }
 0x3cf   : > { %v2601_v42 = vadd.f32 %v4476_v59, %v2600_v40 }
 0x3d0   : > { %2833 = vst.msk [vmem:[%s4483_s28 + $0xb8] sm:$0xff] %vm2809_vm2, %v2606_v39 }
 0x3d1   : > { %2832 = vst.msk [vmem:[%s4483_s28 + $0xb0] sm:$0xff] %vm2809_vm2, %v2601_v42 }
 0x3d5   : > { %v3463_v43 = vpop.f32.mrb[138].mxu1 }
 0x3d6   : > { %v2616_v44 = vadd.f32 %v3463_v43, %v4476_v59  ;;  %v2610_v45 = vpop.f32.mrb[139].mxu1 }
 0x3d7   : > { %v2611_v46 = vadd.f32 %v4476_v59, %v2610_v45 }
 0x3d8   : > { %2835 = vst.msk [vmem:[%s4483_s28 + $0xc8] sm:$0xff] %vm2809_vm2, %v2616_v44 }
 0x3d9   : > { %2834 = vst.msk [vmem:[%s4483_s28 + $0xc0] sm:$0xff] %vm2809_vm2, %v2611_v46 }
 0x3dd   : > { %v3466_v47 = vpop.f32.mrb[140].mxu1 }
 0x3de   : > { %v2626_v48 = vadd.f32 %v3466_v47, %v4476_v59  ;;  %v2620_v49 = vpop.f32.mrb[141].mxu1 }
 0x3df   : > { %v2621_v50 = vadd.f32 %v4476_v59, %v2620_v49 }
 0x3e0   : > { %2837 = vst.msk [vmem:[%s4483_s28 + $0xd8] sm:$0xff] %vm2809_vm2, %v2626_v48 }
 0x3e1   : > { %2836 = vst.msk [vmem:[%s4483_s28 + $0xd0] sm:$0xff] %vm2809_vm2, %v2621_v50 }
 0x3e5   : > { %v3469_v51 = vpop.f32.mrb[142].mxu1 }
 0x3e6   : > { %v2636_v52 = vadd.f32 %v3469_v51, %v4476_v59  ;;  %v2630_v53 = vpop.f32.mrb[143].mxu1 }
 0x3e7   : > { %v2631_v55 = vadd.f32 %v4476_v59, %v2630_v53 }
 0x3e8   : > { %2839 = vst.msk [vmem:[%s4483_s28 + $0xe8] sm:$0xff] %vm2809_vm2, %v2636_v52 }
 0x3e9   : > { %2838 = vst.msk [vmem:[%s4483_s28 + $0xe0] sm:$0xff] %vm2809_vm2, %v2631_v55 }
 0x3ed   : > { %v3472_v57 = vpop.f32.mrb[144].mxu1 }
 0x3ee   : > { %v2646_v60 = vadd.f32 %v3472_v57, %v4476_v59  ;;  %v2640_v61 = vpop.f32.mrb[145].mxu1 }
 0x3ef   : > { %v2641_v62 = vadd.f32 %v4476_v59, %v2640_v61 }
 0x3f0   : > { %2841 = vst.msk [vmem:[%s4483_s28 + $0xf8] sm:$0xff] %vm2809_vm2, %v2646_v60 }
 0x3f1   : > { %2840 = vst.msk [vmem:[%s4483_s28 + $0xf0] sm:$0xff] %vm2809_vm2, %v2641_v62 }
 0x3f5   : > { %v3475_v63 = vpop.f32.mrb[146].mxu1 }
 0x3f6   : > { %v2656_v0 = vadd.f32 %v3475_v63, %v4476_v59  ;;  %v2650_v58 = vpop.f32.mrb[147].mxu1 }
 0x3f7   : > { %v2651_v1 = vadd.f32 %v4476_v59, %v2650_v58 }
 0x3f8   : > { %2843 = vst.msk [vmem:[%s4483_s28 + $0x108] sm:$0xff] %vm2809_vm2, %v2656_v0 }
 0x3f9   : > { %2842 = vst.msk [vmem:[%s4483_s28 + $0x100] sm:$0xff] %vm2809_vm2, %v2651_v1 }
 0x3fd   : > { %v3478_v2 = vpop.f32.mrb[148].mxu1 }
 0x3fe   : > { %v2666_v3 = vadd.f32 %v3478_v2, %v4476_v59  ;;  %v2660_v4 = vpop.f32.mrb[149].mxu1 }
 0x3ff   : > { %v2661_v6 = vadd.f32 %v4476_v59, %v2660_v4 }
 0x400   : > { %2845 = vst.msk [vmem:[%s4483_s28 + $0x118] sm:$0xff] %vm2809_vm2, %v2666_v3 }
 0x401   : > { %2844 = vst.msk [vmem:[%s4483_s28 + $0x110] sm:$0xff] %vm2809_vm2, %v2661_v6 }
 0x405   : > { %v3481_v7 = vpop.f32.mrb[150].mxu1 }
 0x406   : > { %v2676_v8 = vadd.f32 %v3481_v7, %v4476_v59  ;;  %v2670_v9 = vpop.f32.mrb[151].mxu1 }
 0x407   : > { %v2671_v10 = vadd.f32 %v4476_v59, %v2670_v9 }
 0x408   : > { %2847 = vst.msk [vmem:[%s4483_s28 + $0x128] sm:$0xff] %vm2809_vm2, %v2676_v8 }
 0x409   : > { %2846 = vst.msk [vmem:[%s4483_s28 + $0x120] sm:$0xff] %vm2809_vm2, %v2671_v10 }
 0x40d   : > { %v3484_v11 = vpop.f32.mrb[152].mxu1 }
 0x40e   : > { %v2686_v12 = vadd.f32 %v3484_v11, %v4476_v59  ;;  %v2680_v41 = vpop.f32.mrb[153].mxu1 }
 0x40f   : > { %v2681_v13 = vadd.f32 %v4476_v59, %v2680_v41 }
 0x410   : > { %2849 = vst.msk [vmem:[%s4483_s28 + $0x138] sm:$0xff] %vm2809_vm2, %v2686_v12 }
 0x411   : > { %2848 = vst.msk [vmem:[%s4483_s28 + $0x130] sm:$0xff] %vm2809_vm2, %v2681_v13 }
 0x415   : > { %v3487_v14 = vpop.f32.mrb[154].mxu1 }
 0x416   : > { %v2696_v15 = vadd.f32 %v3487_v14, %v4476_v59  ;;  %v2690_v16 = vpop.f32.mrb[155].mxu1 }
 0x417   : > { %v2691_v5 = vadd.f32 %v4476_v59, %v2690_v16 }
 0x418   : > { %2851 = vst.msk [vmem:[%s4483_s28 + $0x148] sm:$0xff] %vm2809_vm2, %v2696_v15 }
 0x419   : > { %2850 = vst.msk [vmem:[%s4483_s28 + $0x140] sm:$0xff] %vm2809_vm2, %v2691_v5 }
 0x41d   : > { %v3490_v17 = vpop.f32.mrb[156].mxu1 }
 0x41e   : > { %v2706_v18 = vadd.f32 %v3490_v17, %v4476_v59  ;;  %v2700_v19 = vpop.f32.mrb[157].mxu1 }
 0x41f   : > { %v2701_v20 = vadd.f32 %v4476_v59, %v2700_v19 }
 0x420   : > { %2853 = vst.msk [vmem:[%s4483_s28 + $0x158] sm:$0xff] %vm2809_vm2, %v2706_v18 }
 0x421   : > { %2852 = vst.msk [vmem:[%s4483_s28 + $0x150] sm:$0xff] %vm2809_vm2, %v2701_v20 }
 0x425   : > { %v3493_v21 = vpop.f32.mrb[158].mxu1 }
 0x426   : > { %v2716_v22 = vadd.f32 %v3493_v21, %v4476_v59  ;;  %v2710_v54 = vpop.f32.mrb[159].mxu1 }
 0x427   : > { %v2711_v23 = vadd.f32 %v4476_v59, %v2710_v54 }
 0x428   : > { %2855 = vst.msk [vmem:[%s4483_s28 + $0x168] sm:$0xff] %vm2809_vm2, %v2716_v22 }
 0x429   : > { %2854 = vst.msk [vmem:[%s4483_s28 + $0x160] sm:$0xff] %vm2809_vm2, %v2711_v23 }
 0x42d   : > { %v3496_v56 = vpop.f32.mrb[160].mxu1 }
 0x42e   : > { %v2726_v24 = vadd.f32 %v3496_v56, %v4476_v59  ;;  %v2720_v25 = vpop.f32.mrb[161].mxu1 }
 0x42f   : > { %v2721_v26 = vadd.f32 %v4476_v59, %v2720_v25 }
 0x430   : > { %2857 = vst.msk [vmem:[%s4483_s28 + $0x178] sm:$0xff] %vm2809_vm2, %v2726_v24 }
 0x431   : > { %2856 = vst.msk [vmem:[%s4483_s28 + $0x170] sm:$0xff] %vm2809_vm2, %v2721_v26 }
 0x435   : > { %v3499_v27 = vpop.f32.mrb[162].mxu1 }
 0x436   : > { %v2736_v28 = vadd.f32 %v3499_v27, %v4476_v59  ;;  %v2730_v29 = vpop.f32.mrb[163].mxu1 }
 0x437   : > { %v2731_v30 = vadd.f32 %v4476_v59, %v2730_v29 }
 0x438   : > { %2859 = vst.msk [vmem:[%s4483_s28 + $0x188] sm:$0xff] %vm2809_vm2, %v2736_v28 }
 0x439   : > { %2858 = vst.msk [vmem:[%s4483_s28 + $0x180] sm:$0xff] %vm2809_vm2, %v2731_v30 }
 0x43d   : > { %v3502_v31 = vpop.f32.mrb[164].mxu1 }
 0x43e   : > { %v2746_v32 = vadd.f32 %v3502_v31, %v4476_v59  ;;  %v2740_v33 = vpop.f32.mrb[165].mxu1 }
 0x43f   : > { %v2741_v34 = vadd.f32 %v4476_v59, %v2740_v33 }
 0x440   : > { %2861 = vst.msk [vmem:[%s4483_s28 + $0x198] sm:$0xff] %vm2809_vm2, %v2746_v32 }
 0x441   : > { %2860 = vst.msk [vmem:[%s4483_s28 + $0x190] sm:$0xff] %vm2809_vm2, %v2741_v34 }
 0x445   : > { %v3505_v35 = vpop.f32.mrb[166].mxu1 }
 0x446   : > { %v2756_v36 = vadd.f32 %v3505_v35, %v4476_v59  ;;  %v2750_v37 = vpop.f32.mrb[167].mxu1 }
 0x447   : > { %v2751_v38 = vadd.f32 %v4476_v59, %v2750_v37 }
 0x448   : > { %2863 = vst.msk [vmem:[%s4483_s28 + $0x1a8] sm:$0xff] %vm2809_vm2, %v2756_v36 }
 0x449   : > { %2862 = vst.msk [vmem:[%s4483_s28 + $0x1a0] sm:$0xff] %vm2809_vm2, %v2751_v38 }
 0x44d   : > { %v3508_v39 = vpop.f32.mrb[168].mxu1 }
 0x44e   : > { %v2766_v40 = vadd.f32 %v3508_v39, %v4476_v59  ;;  %v2760_v42 = vpop.f32.mrb[169].mxu1 }
 0x44f   : > { %v2761_v43 = vadd.f32 %v4476_v59, %v2760_v42 }
 0x450   : > { %2865 = vst.msk [vmem:[%s4483_s28 + $0x1b8] sm:$0xff] %vm2809_vm2, %v2766_v40 }
 0x451   : > { %2864 = vst.msk [vmem:[%s4483_s28 + $0x1b0] sm:$0xff] %vm2809_vm2, %v2761_v43 }
 0x455   : > { %v3511_v44 = vpop.f32.mrb[170].mxu1 }
 0x456   : > { %v2776_v45 = vadd.f32 %v3511_v44, %v4476_v59  ;;  %v2770_v46 = vpop.f32.mrb[171].mxu1 }
 0x457   : > { %v2771_v47 = vadd.f32 %v4476_v59, %v2770_v46 }
 0x458   : > { %2867 = vst.msk [vmem:[%s4483_s28 + $0x1c8] sm:$0xff] %vm2809_vm2, %v2776_v45 }
 0x459   : > { %2866 = vst.msk [vmem:[%s4483_s28 + $0x1c0] sm:$0xff] %vm2809_vm2, %v2771_v47 }
 0x45d   : > { %v3514_v48 = vpop.f32.mrb[172].mxu1 }
 0x45e   : > { %v2786_v49 = vadd.f32 %v3514_v48, %v4476_v59  ;;  %v2780_v50 = vpop.f32.mrb[173].mxu1 }
 0x45f   : > { %v2781_v51 = vadd.f32 %v4476_v59, %v2780_v50 }
 0x460   : > { %2869 = vst.msk [vmem:[%s4483_s28 + $0x1d8] sm:$0xff] %vm2809_vm2, %v2786_v49 }
 0x461   : > { %2868 = vst.msk [vmem:[%s4483_s28 + $0x1d0] sm:$0xff] %vm2809_vm2, %v2781_v51 }
 0x465   : > { %v3517_v52 = vpop.f32.mrb[174].mxu1 }
 0x466   : > { %v2796_v53 = vadd.f32 %v3517_v52, %v4476_v59  ;;  %v2790_v55 = vpop.f32.mrb[175].mxu1 }
 0x467   : > { %v2791_v57 = vadd.f32 %v4476_v59, %v2790_v55 }
 0x468   : > { %2871 = vst.msk [vmem:[%s4483_s28 + $0x1e8] sm:$0xff] %vm2809_vm2, %v2796_v53 }
 0x469   : > { %2870 = vst.msk [vmem:[%s4483_s28 + $0x1e0] sm:$0xff] %vm2809_vm2, %v2791_v57 }
 0x46d   : > { %v3520_v60 = vpop.f32.mrb[176].mxu1 }
 0x46e   : > { %v2806_v61 = vadd.f32 %v3520_v60, %v4476_v59  ;;  %v2800_v62 = vpop.f32.mrb[177].mxu1 }
 0x46f   : > { %v2801_v63 = vadd.f32 %v4476_v59, %v2800_v62 }
 0x470   : > { %2873 = vst.msk [vmem:[%s4483_s28 + $0x1f8] sm:$0xff] %vm2809_vm2, %v2806_v61 }
 0x471   : > { %2872 = vst.msk [vmem:[%s4483_s28 + $0x1f0] sm:$0xff] %vm2809_vm2, %v2801_v63 }
 0x472 PF: > { %s19_s11 = sadd.s32 1, %s3677_s11   ;;  %s4698_s30 = smov %s3673_s10 }
 0x473   : > { %p16_p5 = scmp.ge.s32.totalorder %s19_s11, 4   ;;  %s4699_s10 = smov %s4701_s12 }
 0x475   :  { %18 = sbr.rel (!%p16_p5) target bundleno = 2 (0x2), region = 92 }

</bundles_post_ra>
